<compile_context>
chip_gen: v5e
topology: v5e:2x2
jax: 0.10.0
libtpu: 0.0.40
codegen_flags: <defaults>
</compile_context>

<pallas_src>
import functools

import jax
import jax.numpy as jnp
from jax.experimental import pallas as pl
from jax.experimental.pallas import tpu as pltpu

_HIGHEST = jax.lax.Precision.HIGHEST


def _dot(a, b):
    return jnp.dot(a, b, preferred_element_type=jnp.float32, precision=_HIGHEST)


def _rnn_kernel(n_layers, T, B, *refs):
    # refs layout:
    #   x_flat(T*B, D),
    #   [wih_t_l(D_in, H), whh_t_l(H, H), b_l(1, H)] * n_layers,
    #   wfc_t(H, D_out), bfc(1, D_out), out(B, D_out)
    x_ref = refs[0]
    layer_refs = refs[1:1 + 3 * n_layers]
    wfc_ref = refs[1 + 3 * n_layers]
    bfc_ref = refs[2 + 3 * n_layers]
    out_ref = refs[3 + 3 * n_layers]

    # Hoist all weight loads + bias broadcasts out of the unrolled time loop.
    # (At H=32 this comfortably fits in vregs; see TODO above for H >= 128.)
    wih_ts, whh_ts, biases, hs = [], [], [], []
    for l in range(n_layers):
        wih_t = layer_refs[3 * l + 0][...]            # (D_in, H), pre-transposed
        whh_t = layer_refs[3 * l + 1][...]            # (H, H),   pre-transposed
        b = layer_refs[3 * l + 2][...]                # (1, H),   b_ih + b_hh folded
        H = whh_t.shape[1]
        wih_ts.append(wih_t)
        whh_ts.append(whh_t)
        biases.append(jnp.broadcast_to(b, (B, H)))    # hoisted broadcast
        hs.append(jnp.zeros((B, H), jnp.float32))

    D_out = wfc_ref.shape[1]
    wfc_t = wfc_ref[...]                              # (H, D_out), pre-transposed
    bfc = jnp.broadcast_to(bfc_ref[...], (B, D_out))  # hoisted broadcast

    # Layer-0 input projection as one off-chain GEMM: (T*B, D) @ (D, H0) + b0.
    H0 = whh_ts[0].shape[1]
    xproj0 = _dot(x_ref[...], wih_ts[0]) + jnp.broadcast_to(
        layer_refs[2][...], (T * B, H0))              # (T*B, H0)

    # Time-outer / layer-inner recurrence, fully unrolled (T, L small & static).
    for t in range(T):
        # Layer 0: input projection precomputed; only h @ Whh0^T is on-chain.
        hs[0] = jnp.tanh(xproj0[t * B:(t + 1) * B, :] + _dot(hs[0], whh_ts[0]))
        inp = hs[0]
        for l in range(1, n_layers):
            # Two un-fused dots: the h-dot depends only on h_{t-1} and can
            # overlap with the lower layer's step-t compute.
            pre = _dot(inp, wih_ts[l]) + _dot(hs[l], whh_ts[l]) + biases[l]
            hs[l] = jnp.tanh(pre)
            inp = hs[l]

    # Final linear layer on the top layer's last hidden state.
    out = _dot(hs[-1], wfc_t) + bfc
    out_ref[...] = out.astype(out_ref.dtype)


def rnn_model_forward(x, layer_params, fc_w, fc_b):
    """x: (B, T, D); layer_params: list of (W_ih, W_hh, b_ih, b_hh); fc on last step.

    Matches torch: fc(rnn(x)[0][:, -1, :]) with nn.RNN(batch_first=True, tanh).
    """
    n_layers = len(layer_params)
    assert n_layers >= 1, "n_layers must be >= 1"
    B, T, D = x.shape

    # Layout plumbing done once in the XLA wrapper (never inside the kernel):
    #   x -> time-major and flattened to a dense (T*B, D) slab;
    #   weights pre-transposed; per-layer biases folded (b_ih + b_hh).
    x_flat = (jnp.transpose(x, (1, 0, 2))
              .reshape(T * B, D)
              .astype(jnp.float32))                              # (T*B, D)

    flat_inputs = [x_flat]
    for (wih, whh, bih, bhh) in layer_params:
        flat_inputs += [
            wih.T.astype(jnp.float32),                           # (D_in, H)
            whh.T.astype(jnp.float32),                           # (H, H)
            (bih + bhh).reshape(1, -1).astype(jnp.float32),      # (1, H)
        ]
    flat_inputs += [
        fc_w.T.astype(jnp.float32),                              # (H, D_out)
        fc_b.reshape(1, -1).astype(jnp.float32),                 # (1, D_out)
    ]

    vmem = pltpu.MemorySpace.VMEM
    in_specs = [pl.BlockSpec(memory_space=vmem) for _ in flat_inputs]

    kernel = functools.partial(_rnn_kernel, n_layers, T, B)
    return pl.pallas_call(
        kernel,
        out_shape=jax.ShapeDtypeStruct((B, fc_w.shape[0]), jnp.float32),
        in_specs=in_specs,
        out_specs=pl.BlockSpec(memory_space=vmem),
    )(*flat_inputs)


def _reference_forward(x, layer_params, fc_w, fc_b):
    """Pure-JAX reference matching torch.nn.RNN(batch_first=True) + Linear."""
    B, T, _ = x.shape
    seq = x
    for (wih, whh, bih, bhh) in layer_params:
        H = whh.shape[0]
        h = jnp.zeros((B, H), jnp.float32)
        outs = []
        for t in range(T):
            h = jnp.tanh(jnp.dot(seq[:, t, :], wih.T, precision=_HIGHEST) + bih
                         + jnp.dot(h, whh.T, precision=_HIGHEST) + bhh)
            outs.append(h)
        seq = jnp.stack(outs, axis=1)
    return jnp.dot(seq[:, -1, :], fc_w.T, precision=_HIGHEST) + fc_b


if __name__ == "__main__":
    # Small shapes consistent with the module: batch=2, seq=8, input_dim=16,
    # hidden_dim=32, n_layers=2.
    B, T, D, H, n_layers = 2, 8, 16, 32, 2

    key = jax.random.PRNGKey(0)
    bound = 1.0 / jnp.sqrt(H)

    def uniform(key, shape):
        return jax.random.uniform(key, shape, jnp.float32, -bound, bound)

    keys = jax.random.split(key, 4 * n_layers + 3)
    ki = iter(range(len(keys)))

    layer_params = []
    in_dim = D
    for _ in range(n_layers):
        wih = uniform(keys[next(ki)], (H, in_dim))
        whh = uniform(keys[next(ki)], (H, H))
        bih = uniform(keys[next(ki)], (H,))
        bhh = uniform(keys[next(ki)], (H,))
        layer_params.append((wih, whh, bih, bhh))
        in_dim = H

    fc_w = uniform(keys[next(ki)], (D, H))
    fc_b = uniform(keys[next(ki)], (D,))
    x = jax.random.normal(keys[next(ki)], (B, T, D), jnp.float32)

    out = rnn_model_forward(x, layer_params, fc_w, fc_b)
    out = jax.block_until_ready(out)

    ref = _reference_forward(x, layer_params, fc_w, fc_b)
    assert out.shape == (B, D)
    assert jnp.allclose(out, ref, atol=1e-5, rtol=1e-5), "mismatch vs reference"

    print("KERNEL_OK")
</pallas_src>

<mosaic_0001>
module attributes {stable_mosaic.version = 11 : i64} {
  func.func @_rnn_kernel(%arg0: memref<16x16xf32, #tpu.memory_space<vmem>>, %arg1: memref<16x32xf32, #tpu.memory_space<vmem>>, %arg2: memref<32x32xf32, #tpu.memory_space<vmem>>, %arg3: memref<1x32xf32, #tpu.memory_space<vmem>>, %arg4: memref<32x32xf32, #tpu.memory_space<vmem>>, %arg5: memref<32x32xf32, #tpu.memory_space<vmem>>, %arg6: memref<1x32xf32, #tpu.memory_space<vmem>>, %arg7: memref<32x16xf32, #tpu.memory_space<vmem>>, %arg8: memref<1x16xf32, #tpu.memory_space<vmem>>, %arg9: memref<2x16xf32, #tpu.memory_space<vmem>>) attributes {dimension_semantics = [], scalar_prefetch = 0 : i64, scratch_operands = 0 : i64, tpu.core_type = #tpu.core_type<tc>} {
    %c0 = arith.constant 0 : index
    %c0_0 = arith.constant 0 : index
    %0 = vector.load %arg1[%c0, %c0_0] : memref<16x32xf32, #tpu.memory_space<vmem>>, vector<16x32xf32>
    %c0_1 = arith.constant 0 : index
    %c0_2 = arith.constant 0 : index
    %1 = vector.load %arg2[%c0_1, %c0_2] : memref<32x32xf32, #tpu.memory_space<vmem>>, vector<32x32xf32>
    %cst = arith.constant 0.000000e+00 : f32
    %2 = vector.broadcast %cst : f32 to vector<2x32xf32>
    %c0_3 = arith.constant 0 : index
    %c0_4 = arith.constant 0 : index
    %3 = vector.load %arg4[%c0_3, %c0_4] : memref<32x32xf32, #tpu.memory_space<vmem>>, vector<32x32xf32>
    %c0_5 = arith.constant 0 : index
    %c0_6 = arith.constant 0 : index
    %4 = vector.load %arg5[%c0_5, %c0_6] : memref<32x32xf32, #tpu.memory_space<vmem>>, vector<32x32xf32>
    %c0_7 = arith.constant 0 : index
    %c0_8 = arith.constant 0 : index
    %5 = vector.load %arg6[%c0_7, %c0_8] : memref<1x32xf32, #tpu.memory_space<vmem>>, vector<1x32xf32>
    %6 = vector.shape_cast %5 : vector<1x32xf32> to vector<1x32xf32>
    %7 = vector.broadcast %6 : vector<1x32xf32> to vector<2x32xf32>
    %cst_9 = arith.constant 0.000000e+00 : f32
    %8 = vector.broadcast %cst_9 : f32 to vector<2x32xf32>
    %c0_10 = arith.constant 0 : index
    %c0_11 = arith.constant 0 : index
    %9 = vector.load %arg7[%c0_10, %c0_11] : memref<32x16xf32, #tpu.memory_space<vmem>>, vector<32x16xf32>
    %c0_12 = arith.constant 0 : index
    %c0_13 = arith.constant 0 : index
    %10 = vector.load %arg8[%c0_12, %c0_13] : memref<1x16xf32, #tpu.memory_space<vmem>>, vector<1x16xf32>
    %11 = vector.shape_cast %10 : vector<1x16xf32> to vector<1x16xf32>
    %12 = vector.broadcast %11 : vector<1x16xf32> to vector<2x16xf32>
    %c0_14 = arith.constant 0 : index
    %c0_15 = arith.constant 0 : index
    %13 = vector.load %arg0[%c0_14, %c0_15] : memref<16x16xf32, #tpu.memory_space<vmem>>, vector<16x16xf32>
    %cst_16 = arith.constant dense<0.000000e+00> : vector<16x32xf32>
    %14 = tpu.matmul %13, %0, %cst_16 {dimension_numbers = #tpu.dot_dimension_numbers<[1], [0], [0], [1], [0, 0, 1, 1], [], []>, precision = #tpu.contract_precision<fp32>} : vector<16x16xf32>, vector<16x32xf32>, vector<16x32xf32> -> vector<16x32xf32>
    %c0_17 = arith.constant 0 : index
    %c0_18 = arith.constant 0 : index
    %15 = vector.load %arg3[%c0_17, %c0_18] : memref<1x32xf32, #tpu.memory_space<vmem>>, vector<1x32xf32>
    %16 = vector.shape_cast %15 : vector<1x32xf32> to vector<1x32xf32>
    %17 = vector.broadcast %16 : vector<1x32xf32> to vector<16x32xf32>
    %18 = arith.addf %14, %17 : vector<16x32xf32>
    %19 = vector.extract_strided_slice %18 {offsets = [0, 0], sizes = [2, 32], strides = [1, 1]} : vector<16x32xf32> to vector<2x32xf32>
    %cst_19 = arith.constant dense<0.000000e+00> : vector<2x32xf32>
    %20 = tpu.matmul %2, %1, %cst_19 {dimension_numbers = #tpu.dot_dimension_numbers<[1], [0], [0], [1], [0, 0, 1, 1], [], []>, precision = #tpu.contract_precision<fp32>} : vector<2x32xf32>, vector<32x32xf32>, vector<2x32xf32> -> vector<2x32xf32>
    %21 = arith.addf %19, %20 : vector<2x32xf32>
    %22 = math.tanh %21 : vector<2x32xf32>
    %cst_20 = arith.constant dense<0.000000e+00> : vector<2x32xf32>
    %23 = tpu.matmul %22, %3, %cst_20 {dimension_numbers = #tpu.dot_dimension_numbers<[1], [0], [0], [1], [0, 0, 1, 1], [], []>, precision = #tpu.contract_precision<fp32>} : vector<2x32xf32>, vector<32x32xf32>, vector<2x32xf32> -> vector<2x32xf32>
    %cst_21 = arith.constant dense<0.000000e+00> : vector<2x32xf32>
    %24 = tpu.matmul %8, %4, %cst_21 {dimension_numbers = #tpu.dot_dimension_numbers<[1], [0], [0], [1], [0, 0, 1, 1], [], []>, precision = #tpu.contract_precision<fp32>} : vector<2x32xf32>, vector<32x32xf32>, vector<2x32xf32> -> vector<2x32xf32>
    %25 = arith.addf %23, %24 : vector<2x32xf32>
    %26 = arith.addf %25, %7 : vector<2x32xf32>
    %27 = math.tanh %26 : vector<2x32xf32>
    %28 = vector.extract_strided_slice %18 {offsets = [2, 0], sizes = [2, 32], strides = [1, 1]} : vector<16x32xf32> to vector<2x32xf32>
    %cst_22 = arith.constant dense<0.000000e+00> : vector<2x32xf32>
    %29 = tpu.matmul %22, %1, %cst_22 {dimension_numbers = #tpu.dot_dimension_numbers<[1], [0], [0], [1], [0, 0, 1, 1], [], []>, precision = #tpu.contract_precision<fp32>} : vector<2x32xf32>, vector<32x32xf32>, vector<2x32xf32> -> vector<2x32xf32>
    %30 = arith.addf %28, %29 : vector<2x32xf32>
    %31 = math.tanh %30 : vector<2x32xf32>
    %cst_23 = arith.constant dense<0.000000e+00> : vector<2x32xf32>
    %32 = tpu.matmul %31, %3, %cst_23 {dimension_numbers = #tpu.dot_dimension_numbers<[1], [0], [0], [1], [0, 0, 1, 1], [], []>, precision = #tpu.contract_precision<fp32>} : vector<2x32xf32>, vector<32x32xf32>, vector<2x32xf32> -> vector<2x32xf32>
    %cst_24 = arith.constant dense<0.000000e+00> : vector<2x32xf32>
    %33 = tpu.matmul %27, %4, %cst_24 {dimension_numbers = #tpu.dot_dimension_numbers<[1], [0], [0], [1], [0, 0, 1, 1], [], []>, precision = #tpu.contract_precision<fp32>} : vector<2x32xf32>, vector<32x32xf32>, vector<2x32xf32> -> vector<2x32xf32>
    %34 = arith.addf %32, %33 : vector<2x32xf32>
    %35 = arith.addf %34, %7 : vector<2x32xf32>
    %36 = math.tanh %35 : vector<2x32xf32>
    %37 = vector.extract_strided_slice %18 {offsets = [4, 0], sizes = [2, 32], strides = [1, 1]} : vector<16x32xf32> to vector<2x32xf32>
    %cst_25 = arith.constant dense<0.000000e+00> : vector<2x32xf32>
    %38 = tpu.matmul %31, %1, %cst_25 {dimension_numbers = #tpu.dot_dimension_numbers<[1], [0], [0], [1], [0, 0, 1, 1], [], []>, precision = #tpu.contract_precision<fp32>} : vector<2x32xf32>, vector<32x32xf32>, vector<2x32xf32> -> vector<2x32xf32>
    %39 = arith.addf %37, %38 : vector<2x32xf32>
    %40 = math.tanh %39 : vector<2x32xf32>
    %cst_26 = arith.constant dense<0.000000e+00> : vector<2x32xf32>
    %41 = tpu.matmul %40, %3, %cst_26 {dimension_numbers = #tpu.dot_dimension_numbers<[1], [0], [0], [1], [0, 0, 1, 1], [], []>, precision = #tpu.contract_precision<fp32>} : vector<2x32xf32>, vector<32x32xf32>, vector<2x32xf32> -> vector<2x32xf32>
    %cst_27 = arith.constant dense<0.000000e+00> : vector<2x32xf32>
    %42 = tpu.matmul %36, %4, %cst_27 {dimension_numbers = #tpu.dot_dimension_numbers<[1], [0], [0], [1], [0, 0, 1, 1], [], []>, precision = #tpu.contract_precision<fp32>} : vector<2x32xf32>, vector<32x32xf32>, vector<2x32xf32> -> vector<2x32xf32>
    %43 = arith.addf %41, %42 : vector<2x32xf32>
    %44 = arith.addf %43, %7 : vector<2x32xf32>
    %45 = math.tanh %44 : vector<2x32xf32>
    %46 = vector.extract_strided_slice %18 {offsets = [6, 0], sizes = [2, 32], strides = [1, 1]} : vector<16x32xf32> to vector<2x32xf32>
    %cst_28 = arith.constant dense<0.000000e+00> : vector<2x32xf32>
    %47 = tpu.matmul %40, %1, %cst_28 {dimension_numbers = #tpu.dot_dimension_numbers<[1], [0], [0], [1], [0, 0, 1, 1], [], []>, precision = #tpu.contract_precision<fp32>} : vector<2x32xf32>, vector<32x32xf32>, vector<2x32xf32> -> vector<2x32xf32>
    %48 = arith.addf %46, %47 : vector<2x32xf32>
    %49 = math.tanh %48 : vector<2x32xf32>
    %cst_29 = arith.constant dense<0.000000e+00> : vector<2x32xf32>
    %50 = tpu.matmul %49, %3, %cst_29 {dimension_numbers = #tpu.dot_dimension_numbers<[1], [0], [0], [1], [0, 0, 1, 1], [], []>, precision = #tpu.contract_precision<fp32>} : vector<2x32xf32>, vector<32x32xf32>, vector<2x32xf32> -> vector<2x32xf32>
    %cst_30 = arith.constant dense<0.000000e+00> : vector<2x32xf32>
    %51 = tpu.matmul %45, %4, %cst_30 {dimension_numbers = #tpu.dot_dimension_numbers<[1], [0], [0], [1], [0, 0, 1, 1], [], []>, precision = #tpu.contract_precision<fp32>} : vector<2x32xf32>, vector<32x32xf32>, vector<2x32xf32> -> vector<2x32xf32>
    %52 = arith.addf %50, %51 : vector<2x32xf32>
    %53 = arith.addf %52, %7 : vector<2x32xf32>
    %54 = math.tanh %53 : vector<2x32xf32>
    %55 = vector.extract_strided_slice %18 {offsets = [8, 0], sizes = [2, 32], strides = [1, 1]} : vector<16x32xf32> to vector<2x32xf32>
    %cst_31 = arith.constant dense<0.000000e+00> : vector<2x32xf32>
    %56 = tpu.matmul %49, %1, %cst_31 {dimension_numbers = #tpu.dot_dimension_numbers<[1], [0], [0], [1], [0, 0, 1, 1], [], []>, precision = #tpu.contract_precision<fp32>} : vector<2x32xf32>, vector<32x32xf32>, vector<2x32xf32> -> vector<2x32xf32>
    %57 = arith.addf %55, %56 : vector<2x32xf32>
    %58 = math.tanh %57 : vector<2x32xf32>
    %cst_32 = arith.constant dense<0.000000e+00> : vector<2x32xf32>
    %59 = tpu.matmul %58, %3, %cst_32 {dimension_numbers = #tpu.dot_dimension_numbers<[1], [0], [0], [1], [0, 0, 1, 1], [], []>, precision = #tpu.contract_precision<fp32>} : vector<2x32xf32>, vector<32x32xf32>, vector<2x32xf32> -> vector<2x32xf32>
    %cst_33 = arith.constant dense<0.000000e+00> : vector<2x32xf32>
    %60 = tpu.matmul %54, %4, %cst_33 {dimension_numbers = #tpu.dot_dimension_numbers<[1], [0], [0], [1], [0, 0, 1, 1], [], []>, precision = #tpu.contract_precision<fp32>} : vector<2x32xf32>, vector<32x32xf32>, vector<2x32xf32> -> vector<2x32xf32>
    %61 = arith.addf %59, %60 : vector<2x32xf32>
    %62 = arith.addf %61, %7 : vector<2x32xf32>
    %63 = math.tanh %62 : vector<2x32xf32>
    %64 = vector.extract_strided_slice %18 {offsets = [10, 0], sizes = [2, 32], strides = [1, 1]} : vector<16x32xf32> to vector<2x32xf32>
    %cst_34 = arith.constant dense<0.000000e+00> : vector<2x32xf32>
    %65 = tpu.matmul %58, %1, %cst_34 {dimension_numbers = #tpu.dot_dimension_numbers<[1], [0], [0], [1], [0, 0, 1, 1], [], []>, precision = #tpu.contract_precision<fp32>} : vector<2x32xf32>, vector<32x32xf32>, vector<2x32xf32> -> vector<2x32xf32>
    %66 = arith.addf %64, %65 : vector<2x32xf32>
    %67 = math.tanh %66 : vector<2x32xf32>
    %cst_35 = arith.constant dense<0.000000e+00> : vector<2x32xf32>
    %68 = tpu.matmul %67, %3, %cst_35 {dimension_numbers = #tpu.dot_dimension_numbers<[1], [0], [0], [1], [0, 0, 1, 1], [], []>, precision = #tpu.contract_precision<fp32>} : vector<2x32xf32>, vector<32x32xf32>, vector<2x32xf32> -> vector<2x32xf32>
    %cst_36 = arith.constant dense<0.000000e+00> : vector<2x32xf32>
    %69 = tpu.matmul %63, %4, %cst_36 {dimension_numbers = #tpu.dot_dimension_numbers<[1], [0], [0], [1], [0, 0, 1, 1], [], []>, precision = #tpu.contract_precision<fp32>} : vector<2x32xf32>, vector<32x32xf32>, vector<2x32xf32> -> vector<2x32xf32>
    %70 = arith.addf %68, %69 : vector<2x32xf32>
    %71 = arith.addf %70, %7 : vector<2x32xf32>
    %72 = math.tanh %71 : vector<2x32xf32>
    %73 = vector.extract_strided_slice %18 {offsets = [12, 0], sizes = [2, 32], strides = [1, 1]} : vector<16x32xf32> to vector<2x32xf32>
    %cst_37 = arith.constant dense<0.000000e+00> : vector<2x32xf32>
    %74 = tpu.matmul %67, %1, %cst_37 {dimension_numbers = #tpu.dot_dimension_numbers<[1], [0], [0], [1], [0, 0, 1, 1], [], []>, precision = #tpu.contract_precision<fp32>} : vector<2x32xf32>, vector<32x32xf32>, vector<2x32xf32> -> vector<2x32xf32>
    %75 = arith.addf %73, %74 : vector<2x32xf32>
    %76 = math.tanh %75 : vector<2x32xf32>
    %cst_38 = arith.constant dense<0.000000e+00> : vector<2x32xf32>
    %77 = tpu.matmul %76, %3, %cst_38 {dimension_numbers = #tpu.dot_dimension_numbers<[1], [0], [0], [1], [0, 0, 1, 1], [], []>, precision = #tpu.contract_precision<fp32>} : vector<2x32xf32>, vector<32x32xf32>, vector<2x32xf32> -> vector<2x32xf32>
    %cst_39 = arith.constant dense<0.000000e+00> : vector<2x32xf32>
    %78 = tpu.matmul %72, %4, %cst_39 {dimension_numbers = #tpu.dot_dimension_numbers<[1], [0], [0], [1], [0, 0, 1, 1], [], []>, precision = #tpu.contract_precision<fp32>} : vector<2x32xf32>, vector<32x32xf32>, vector<2x32xf32> -> vector<2x32xf32>
    %79 = arith.addf %77, %78 : vector<2x32xf32>
    %80 = arith.addf %79, %7 : vector<2x32xf32>
    %81 = math.tanh %80 : vector<2x32xf32>
    %82 = vector.extract_strided_slice %18 {offsets = [14, 0], sizes = [2, 32], strides = [1, 1]} : vector<16x32xf32> to vector<2x32xf32>
    %cst_40 = arith.constant dense<0.000000e+00> : vector<2x32xf32>
    %83 = tpu.matmul %76, %1, %cst_40 {dimension_numbers = #tpu.dot_dimension_numbers<[1], [0], [0], [1], [0, 0, 1, 1], [], []>, precision = #tpu.contract_precision<fp32>} : vector<2x32xf32>, vector<32x32xf32>, vector<2x32xf32> -> vector<2x32xf32>
    %84 = arith.addf %82, %83 : vector<2x32xf32>
    %85 = math.tanh %84 : vector<2x32xf32>
    %cst_41 = arith.constant dense<0.000000e+00> : vector<2x32xf32>
    %86 = tpu.matmul %85, %3, %cst_41 {dimension_numbers = #tpu.dot_dimension_numbers<[1], [0], [0], [1], [0, 0, 1, 1], [], []>, precision = #tpu.contract_precision<fp32>} : vector<2x32xf32>, vector<32x32xf32>, vector<2x32xf32> -> vector<2x32xf32>
    %cst_42 = arith.constant dense<0.000000e+00> : vector<2x32xf32>
    %87 = tpu.matmul %81, %4, %cst_42 {dimension_numbers = #tpu.dot_dimension_numbers<[1], [0], [0], [1], [0, 0, 1, 1], [], []>, precision = #tpu.contract_precision<fp32>} : vector<2x32xf32>, vector<32x32xf32>, vector<2x32xf32> -> vector<2x32xf32>
    %88 = arith.addf %86, %87 : vector<2x32xf32>
    %89 = arith.addf %88, %7 : vector<2x32xf32>
    %90 = math.tanh %89 : vector<2x32xf32>
    %cst_43 = arith.constant dense<0.000000e+00> : vector<2x16xf32>
    %91 = tpu.matmul %90, %9, %cst_43 {dimension_numbers = #tpu.dot_dimension_numbers<[1], [0], [0], [1], [0, 0, 1, 1], [], []>, precision = #tpu.contract_precision<fp32>} : vector<2x32xf32>, vector<32x16xf32>, vector<2x16xf32> -> vector<2x16xf32>
    %92 = arith.addf %91, %12 : vector<2x16xf32>
    %c0_44 = arith.constant 0 : index
    %c0_45 = arith.constant 0 : index
    %93 = vector.load %arg9[%c0_44, %c0_45] : memref<2x16xf32, #tpu.memory_space<vmem>>, vector<2x16xf32>
    tpu.vector_store %arg9[%c0_44, %c0_45], %92 {strides = array<i32>} : memref<2x16xf32, #tpu.memory_space<vmem>>, vector<2x16xf32>,
    return
  }
}

</mosaic_0001>

<bundles_post_ra>
// kernel: tpu_custom_call.1
= control target key start
LH: loop header
LB: loop body
LE: loop exit
PB: predicated region body
PF: predicated region fallthrough
CT: control target
= control target key end

     0   :  { %14 = vsyncpa [#allocation3], 0  ;;  %s6157_s0 = inlined_call_operand.vmem [shape: f32[16,16], index: 0, kind: input, shape index: {}]   ;;  %s6158_s1 = inlined_call_operand.hbm [shape: f32[16,32], index: 1, kind: input, shape index: {}]   ;;  %s6159_s2 = inlined_call_operand.vmem [shape: f32[32,32], index: 2, kind: input, shape index: {}]   ;;  %s6160_s3 = inlined_call_operand.vmem [shape: f32[1,32], index: 3, kind: input, shape index: {}]   ;;  %s6161_s4 = inlined_call_operand.hbm [shape: f32[32,32], index: 4, kind: input, shape index: {}]   ;;  %s6162_s5 = inlined_call_operand.hbm [shape: f32[32,32], index: 5, kind: input, shape index: {}]   ;;  %s6163_s6 = inlined_call_operand.vmem [shape: f32[1,32], index: 6, kind: input, shape index: {}]   ;;  %s6164_s7 = inlined_call_operand.vmem [shape: f32[32,16], index: 7, kind: input, shape index: {}]   ;;  %s6165_s8 = inlined_call_operand.vmem [shape: f32[1,16], index: 8, kind: input, shape index: {}]   ;;  %s6166_s9 = inlined_call_operand.hbm [shape: f32[2,16], index: 9, kind: output, shape index: {}]  }
   0x1   :  { %15 = vsyncpa [#allocation6], 0 }
   0x2   :  { %16 = vsyncpa [#allocation4], 0  ;;  %s40_s11 = sshll.u32 %s6161_s4, 4  ;;  %s5208_s12 = smov [#allocation5]   ;;  %s41_s11 = int_to_ptr.hbm [resolvable:$true] %s40_s11 }
   0x3   :  { %s42_s13 = sshll.u32 %s5208_s12, 4  ;;  %s23_s16 = sshll.u32 %s6158_s1, 4  ;;  %s43_s13 = int_to_ptr.vmem [resolvable:$true] %s42_s13  ;;  %s24_s16 = int_to_ptr.hbm [resolvable:$true] %s23_s16 }
   0x4   :  { %s5209_s17 = smov 128   ;;  %s5210_s18 = smov 8  }
   0x5   :  { %48 = dma.hbm_to_vmem [thread:$0]  %s41_s11, 512, %s43_s13, [#allocation6], %s5209_s17, %s5209_s17, %s5210_s18  }
   0x6   :  { %s5211_s19 = smov [#allocation2]   ;;  %s53_s23 = sshll.u32 %s6162_s5, 4  ;;  %s54_s23 = int_to_ptr.hbm [resolvable:$true] %s53_s23 }
   0x7   :  { %s25_s20 = sshll.u32 %s5211_s19, 4  ;;  %s5212_s4 = smov [#allocation7]   ;;  %s26_s20 = int_to_ptr.vmem [resolvable:$true] %s25_s20 }
   0x8   :  { %31 = dma.hbm_to_vmem [thread:$0]  %s24_s16, 256, %s26_s20, [#allocation3], %s5209_s17, %s5209_s17, %s5210_s18  }
   0x9   :  { %s55_s24 = sshll.u32 %s5212_s4, 4  ;;  %s56_s24 = int_to_ptr.vmem [resolvable:$true] %s55_s24 }
   0xa   :  { %61 = dma.hbm_to_vmem [thread:$0]  %s54_s23, 512, %s56_s24, [#allocation6], %s5209_s17, %s5209_s17, %s5210_s18  }
   0xb   :  { %5202 = dma.done.wait [#allocation3], 256  }
   0xc   :  { %5203 = vsyncadd [#allocation3], 4294967040 }
   0xd   :  { %5204 = dma.done.wait [#allocation6], 1024  }
   0xe   :  { %5205 = vsyncadd [#allocation6], 4294966272  ;;  %vm112_vm0 = vcmask 130048   ;;  %v81_v0 = vld [vmem:[#allocation2 + $0x8] sm:$0xff]  ;;  %v80_v1 = vld [vmem:[#allocation2] sm:$0xff]  ;;  %v5213_v50 = vmov 0.0  }
   0xf   :  { %v106_v2 = vld [vmem:[%s6157_s0] sm:$0xff]  ;;  %v5277_v3 = vand.u32 4294901760, %v81_v0  ;;  %v5279_v4 = vand.u32 4294901760, %v80_v1  ;;  %v85_v6 = vld [vmem:[%s6159_s2 + $0x18] sm:$0xff]  ;;  %v84_v7 = vld [vmem:[%s6159_s2 + $0x10] sm:$0xff]  ;;  %vm309_vm1 = vcmask 261120  }
  0x10   :  { %v114_v5 = vsel %vm112_vm0, %v106_v2, 0  ;;  %v107_v8 = vld [vmem:[%s6157_s0 + $0x8] sm:$0xff]  ;;  %v5292_v10 = vand.u32 4294901760, %v85_v6  ;;  %v5294_v11 = vand.u32 4294901760, %v84_v7  ;;  %v82_v14 = vld [vmem:[%s6159_s2] sm:$0xff]  ;;  %v91_v56 = vld [vmem:[#allocation7 + $0x8] sm:$0xff] }
  0x11   :  { %v5290_v9 = vand.u32 4294901760, %v114_v5  ;;  %v117_v12 = vsel %vm112_vm0, %v107_v8, 0  ;;  %v83_v13 = vld [vmem:[%s6159_s2 + $0x8] sm:$0xff]  ;;  %v169_v15 = vsub.f32 %v81_v0, %v5277_v3  ;;  %v175_v16 = vsub.f32 %v80_v1, %v5279_v4  ;;  %235 = vmatpush.msra.mxu3 %v5277_v3  ;;  %134 = vmatpush.msra.mxu0 %v5277_v3  ;;  %v92_v53 = vld [vmem:[#allocation7 + $0x10] sm:$0xff]  ;;  %v90_v60 = vld [vmem:[#allocation7] sm:$0xff]  ;;  %s5214_s25 = smov [#allocation8]  }
  0x12   :  { %v5306_v17 = vand.u32 4294901760, %v117_v12  ;;  %v5308_v18 = vand.u32 4294901760, %v83_v13  ;;  %v5312_v20 = vsub.f32 %v85_v6, %v5292_v10  ;;  %v5315_v21 = vsub.f32 %v84_v7, %v5294_v11  ;;  %v93_v51 = vld [vmem:[#allocation7 + $0x18] sm:$0xff]  ;;  %s5049_s5 = sshll.u32 %s5214_s25, 4  ;;  %s5051_s28 = sshll.u32 %s6166_s9, 4  ;;  %s5050_s5 = int_to_ptr.vmem [resolvable:$true] %s5049_s5  ;;  %s5052_s28 = int_to_ptr.hbm [resolvable:$true] %s5051_s28 }
  0x13   :  { %v138_v19 = vsub.f32 %v114_v5, %v5290_v9  ;;  %v5317_v22 = vand.u32 4294901760, %v82_v14  ;;  %205 = vmatpush.msra.mxu2 %v169_v15  ;;  %237 = vmatpush.msra.mxu3 %v5279_v4  ;;  %v170_v23 = vand.u32 4294901760, %v169_v15  ;;  %v176_v24 = vand.u32 4294901760, %v175_v16  ;;  %v89_v8 = vld [vmem:[#allocation5 + $0x18] sm:$0xff] }
  0x14   :  { %v146_v25 = vsub.f32 %v117_v12, %v5306_v17  ;;  %v5322_v26 = vsub.f32 %v83_v13, %v5308_v18  ;;  %136 = vmatpush.msra.mxu0 %v5279_v4  ;;  %v5326_v28 = vand.u32 4294901760, %v5312_v20  ;;  %v5329_v29 = vand.u32 4294901760, %v5315_v21 }
  0x15   :  { %v139_v27 = vand.u32 4294901760, %v138_v19  ;;  %v5332_v30 = vsub.f32 %v82_v14, %v5317_v22  ;;  %208 = vmatpush.msra.mxu2 %v175_v16  ;;  %v171_v31 = vsub.f32 %v169_v15, %v170_v23  ;;  %v177_v32 = vsub.f32 %v175_v16, %v176_v24  ;;  %v88_v15 = vld [vmem:[#allocation5 + $0x10] sm:$0xff] }
  0x16   :  { %268 = vmatpush.msrb.mxu0 %v170_v23  ;;  %v147_v33 = vand.u32 4294901760, %v146_v25  ;;  %v5335_v34 = vand.u32 4294901760, %v5322_v26  ;;  %211 = vmatmul.f32.vlgmr.msra.gmra.mxu2 %v138_v19  ;;  %v357_v36 = vsub.f32 %v5312_v20, %v5326_v28  ;;  %v363_v37 = vsub.f32 %v5315_v21, %v5329_v29 }
  0x17   :  { %241 = vmatmul.f32.vlgmr.msra.gmra.mxu3 %v139_v27  ;;  %v140_v35 = vsub.f32 %v138_v19, %v139_v27  ;;  %v5342_v38 = vand.u32 4294901760, %v5332_v30  ;;  %326 = vmatpush.msrb.mxu2 %v5292_v10  ;;  %v172_v39 = vand.u32 4294901760, %v171_v31  ;;  %v178_v40 = vand.u32 4294901760, %v177_v32  ;;  %v87_v27 = vld [vmem:[#allocation5 + $0x8] sm:$0xff] }
  0x18   :  { %272 = vmatpush.msrb.mxu0 %v176_v24  ;;  %v369_v41 = vsub.f32 %v5322_v26, %v5335_v34  ;;  %v5347_v43 = vand.u32 4294901760, %v357_v36  ;;  %v5349_v44 = vand.u32 4294901760, %v363_v37  ;;  %v148_v46 = vsub.f32 %v146_v25, %v147_v33 }
  0x19   :  { %v141_v42 = vand.u32 4294901760, %v140_v35  ;;  %173 = vmatpush.msra.mxu1 %v172_v39  ;;  %328 = vmatpush.msrb.mxu2 %v5294_v11  ;;  %v375_v45 = vsub.f32 %v5332_v30, %v5342_v38  ;;  %v5394_v52 = vand.u32 4294901760, %v93_v51  ;;  %v5397_v54 = vand.u32 4294901760, %v92_v53  ;;  %v86_v35 = vld [vmem:[#allocation5] sm:$0xff] }
  0x1a   :  { %6194 = vst [vmem:[#allocation12_spill] sm:$0xff] %v5349_v44  ;;  %359 = vmatpush.msrb.mxu3 %v5347_v43  ;;  %v5356_v47 = vand.u32 4294901760, %v369_v41  ;;  %v149_v49 = vand.u32 4294901760, %v148_v46  ;;  %v5407_v58 = vand.u32 4294901760, %v91_v56  ;;  %v5420_v63 = vand.u32 4294901760, %v90_v60 }
  0x1b   :  { %142 = vmatmul.f32.vlgmr.msra.gmra.mxu0 %v141_v42  ;;  %179 = vmatpush.msra.mxu1 %v178_v40  ;;  %v5362_v48 = vand.u32 4294901760, %v375_v45  ;;  %v5400_v55 = vsub.f32 %v93_v51, %v5394_v52  ;;  %v5410_v59 = vsub.f32 %v92_v53, %v5397_v54  ;;  %v5459_v14 = vand.u32 4294901760, %v89_v8 }
  0x1c   :  { %330 = vmatpush.msrb.mxu2 %v5308_v18  ;;  %181 = vmatmul.f32.vlgmr.msra.gmra.mxu1 %v5290_v9  ;;  %6197 = vst [vmem:[#allocation15_spill] sm:$0xff] %v5420_v63  ;;  %v5423_v0 = vsub.f32 %v91_v56, %v5407_v58  ;;  %v5473_v24 = vand.u32 4294901760, %v88_v15  ;;  %v5500_v40 = vand.u32 4294901760, %v86_v35  ;;  %vm5042_vm2 = vcmask 123904  }
  0x1d   :  { %365 = vmatpush.msrb.mxu3 %v5349_v44  ;;  %297 = vmatpush.msrb.mxu1 %v5277_v3  ;;  %v5405_v57 = vand.u32 4294901760, %v5400_v55  ;;  %v5418_v62 = vand.u32 4294901760, %v5410_v59  ;;  %v5471_v23 = vsub.f32 %v89_v8, %v5459_v14 }
  0x1e   :  { %332 = vmatpush.msrb.mxu2 %v5317_v22  ;;  %455 = vmatpush.msra.mxu0 %v5326_v28  ;;  %v5433_v3 = vand.u32 4294901760, %v5423_v0  ;;  %v5484_v32 = vsub.f32 %v88_v15, %v5473_v24 }
  0x1f   :  { %216 = vmatmul.f32.gmra.mxu2 %v146_v25  ;;  %247 = vmatmul.f32.gmra.mxu3 %v147_v33  ;;  %6195 = vst [vmem:[#allocation13_spill] sm:$0xff] %v5405_v57  ;;  %v544_v61 = vsub.f32 %v5400_v55, %v5405_v57  ;;  %v550_v2 = vsub.f32 %v5410_v59, %v5418_v62  ;;  %v5481_v31 = vand.u32 4294901760, %v5471_v23  ;;  %v5486_v33 = vand.u32 4294901760, %v87_v27 }
  0x20   :  { %371 = vmatpush.msrb.mxu3 %v5356_v47  ;;  %299 = vmatpush.msrb.mxu1 %v5279_v4  ;;  %6196 = vst [vmem:[#allocation14_spill] sm:$0xff] %v5418_v62  ;;  %v5436_v4 = vsub.f32 %v90_v60, %v5420_v63  ;;  %v556_v6 = vsub.f32 %v5423_v0, %v5433_v3  ;;  %v5494_v37 = vand.u32 4294901760, %v5484_v32 }
  0x21   :  { %397 = vmatpush.msra.mxu2 %v5312_v20  ;;  %459 = vmatpush.msra.mxu0 %v5329_v29  ;;  %v5427_v1 = vand.u32 4294901760, %v544_v61  ;;  %6198 = vst [vmem:[#allocation16_spill] sm:$0xff] %v5433_v3  ;;  %v5442_v5 = vand.u32 4294901760, %v550_v2  ;;  %v732_v36 = vsub.f32 %v5471_v23, %v5481_v31  ;;  %v5498_v39 = vsub.f32 %v87_v27, %v5486_v33 }
  0x22   :  { %377 = vmatpush.msrb.mxu3 %v5362_v48  ;;  %486 = vmatpush.msra.mxu1 %v5292_v10  ;;  %v5447_v7 = vand.u32 4294901760, %v5436_v4  ;;  %v5454_v12 = vand.u32 4294901760, %v556_v6  ;;  %v738_v45 = vsub.f32 %v5484_v32, %v5494_v37 }
  0x23   :  { %150 = vmatmul.f32.gmra.mxu0 %v149_v49  ;;  %400 = vmatpush.msra.mxu2 %v5315_v21  ;;  %6200 = vst [vmem:[#allocation18_spill] sm:$0xff] %v5498_v39  ;;  %v5506_v42 = vand.u32 4294901760, %v732_v36  ;;  %v5511_v46 = vand.u32 4294901760, %v5498_v39  ;;  %v5515_v49 = vsub.f32 %v86_v35, %v5500_v40 }
  0x24   :  { %426 = vmatpush.msra.mxu3 %v5292_v10  ;;  %185 = vmatmul.f32.gmra.mxu1 %v5306_v17  ;;  %6199 = vst [vmem:[#allocation17_spill] sm:$0xff] %v5447_v7  ;;  %v562_v13 = vsub.f32 %v5436_v4, %v5447_v7  ;;  %v5524_v56 = vand.u32 4294901760, %v738_v45 }
  0x25   :  { %403 = vmatpush.msra.mxu2 %v5322_v26  ;;  %488 = vmatpush.msra.mxu1 %v5294_v11  ;;  %6202 = vst [vmem:[#allocation20_spill] sm:$0xff] %v5506_v42  ;;  %v744_v60 = vsub.f32 %v5498_v39, %v5511_v46  ;;  %v5529_v61 = vand.u32 4294901760, %v5515_v49 }
  0x26   :  { %428 = vmatpush.msra.mxu3 %v5294_v11  ;;  %463 = vmatpush.msra.mxu0 %v5335_v34  ;;  %v5467_v19 = vand.u32 4294901760, %v562_v13  ;;  %6203 = vst [vmem:[#allocation21_spill] sm:$0xff] %v5515_v49  ;;  %v5069_v13 = vld [vmem:[%s6160_s3] ss:$0 sm:$0xff] }
  0x27   :  { %338 = vmatmul.f32.vlgmr.msrb.gmra.mxu2 %v5213_v50  ;;  %379 = vmatmul.f32.vlgmr.msrb.gmra.mxu3 %v5213_v50  ;;  %6206 = vst [vmem:[#allocation24_spill] sm:$0xff] %v5524_v56  ;;  %v5537_v6 = vand.u32 4294901760, %v744_v60  ;;  %v750_v8 = vsub.f32 %v5515_v49, %v5529_v61 }
  0x28   :  { %406 = vmatpush.msra.mxu2 %v5332_v30  ;;  %430 = vmatpush.msra.mxu3 %v5308_v18  ;;  %6207 = vst [vmem:[#allocation25_spill] sm:$0xff] %v5529_v61 }
  0x29   :  { %490 = vmatpush.msra.mxu1 %v5308_v18  ;;  %467 = vmatpush.msra.mxu0 %v5342_v38  ;;  %6209 = vst [vmem:[#allocation27_spill] sm:$0xff] %v5537_v6  ;;  %v5548_v15 = vand.u32 4294901760, %v750_v8 }
  0x2a   :  { %432 = vmatpush.msra.mxu3 %v5317_v22  ;;  %513 = vmatpush.msrb.mxu2 %v5394_v52 }
  0x2b   :  { %274 = vmatmul.f32.vlgmr.msrb.gmra.mxu0 %v5290_v9  ;;  %492 = vmatpush.msra.mxu1 %v5317_v22  ;;  %6210 = vst [vmem:[#allocation28_spill] sm:$0xff] %v5548_v15 }
  0x2c   :  { %301 = vmatmul.f32.vlgmr.msrb.gmra.mxu1 %v5290_v9  ;;  %515 = vmatpush.msrb.mxu2 %v5397_v54 }
  0x2d   :  { %613 = vmatpush.msrb.mxu1 %v5394_v52  ;;  %584 = vmatpush.msrb.mxu0 %v5400_v55 }
  0x2e   :  { %517 = vmatpush.msrb.mxu2 %v5407_v58  ;;  %546 = vmatpush.msrb.mxu3 %v5427_v1 }
  0x2f   :  { %409 = vmatmul.f32.vlgmr.msra.gmra.mxu2 %v5213_v50  ;;  %436 = vmatmul.f32.vlgmr.msra.gmra.mxu3 %v5213_v50 }
  0x30   :  { %615 = vmatpush.msrb.mxu1 %v5397_v54  ;;  %587 = vmatpush.msrb.mxu0 %v5410_v59 }
  0x31   :  { %519 = vmatpush.msrb.mxu2 %v5420_v63  ;;  %552 = vmatpush.msrb.mxu3 %v5442_v5 }
  0x32   :  { %617 = vmatpush.msrb.mxu1 %v5407_v58  ;;  %590 = vmatpush.msrb.mxu0 %v5423_v0 }
  0x33   :  { %278 = vmatmul.f32.gmra.mxu0 %v5306_v17  ;;  %642 = vmatpush.msra.mxu2 %v5405_v57 }
  0x34   :  { %305 = vmatmul.f32.gmra.mxu1 %v5306_v17  ;;  %593 = vmatpush.msrb.mxu0 %v5436_v4 }
  0x35   :  { %619 = vmatpush.msrb.mxu1 %v5420_v63  ;;  %646 = vmatpush.msra.mxu2 %v5418_v62 }
  0x36   :  { %558 = vmatpush.msrb.mxu3 %v5454_v12 }
  0x37   :  { %525 = vmatmul.f32.vlgmr.msrb.gmra.mxu2 %v5213_v50 }
  0x38   :  { %650 = vmatpush.msra.mxu2 %v5433_v3  ;;  %564 = vmatpush.msrb.mxu3 %v5467_v19 }
  0x39   :  { %566 = vmatmul.f32.vlgmr.msrb.gmra.mxu3 %v5213_v50 }
  0x3a   :  { %654 = vmatpush.msra.mxu2 %v5447_v7  ;;  %673 = vmatpush.msra.mxu3 %v5394_v52 }
  0x3b   :  { %469 = vmatmul.f32.vlgmr.msra.gmra.mxu0 %v5213_v50 }
  0x3c   :  { %494 = vmatmul.f32.vlgmr.msra.gmra.mxu1 %v5213_v50  ;;  %772 = vmatpush.msrb.mxu2 %v5471_v23 }
  0x3d   :  { %701 = vmatpush.msra.mxu0 %v5459_v14  ;;  %675 = vmatpush.msra.mxu3 %v5397_v54 }
  0x3e   :  { %775 = vmatpush.msrb.mxu2 %v5484_v32  ;;  %734 = vmatpush.msra.mxu1 %v5506_v42 }
  0x3f   :  { %656 = vmatmul.f32.vlgmr.msra.gmra.mxu2 %v5213_v50  ;;  %703 = vmatpush.msra.mxu0 %v5473_v24 }
  0x40   :  { %677 = vmatpush.msra.mxu3 %v5407_v58  ;;  %778 = vmatpush.msrb.mxu2 %v5498_v39 }
  0x41   :  { %705 = vmatpush.msra.mxu0 %v5486_v33  ;;  %740 = vmatpush.msra.mxu1 %v5524_v56 }
  0x42   :  { %679 = vmatpush.msra.mxu3 %v5420_v63  ;;  %781 = vmatpush.msrb.mxu2 %v5515_v49 }
  0x43   :  { %596 = vmatmul.f32.vlgmr.msrb.gmra.mxu0 %v5213_v50  ;;  %681 = vmatmul.f32.vlgmr.msra.gmra.mxu3 %v5213_v50 }
  0x44   :  { %623 = vmatmul.f32.vlgmr.msrb.gmra.mxu1 %v5213_v50  ;;  %801 = vmatpush.msrb.mxu3 %v5459_v14 }
  0x45   :  { %746 = vmatpush.msra.mxu1 %v5537_v6  ;;  %888 = vmatpush.msra.mxu2 %v5292_v10 }
  0x46   :  { %707 = vmatpush.msra.mxu0 %v5500_v40  ;;  %803 = vmatpush.msrb.mxu3 %v5473_v24 }
  0x47   :  { %752 = vmatpush.msra.mxu1 %v5548_v15  ;;  %890 = vmatpush.msra.mxu2 %v5294_v11 }
  0x48   :  { %805 = vmatpush.msrb.mxu3 %v5486_v33  ;;  %830 = vmatpush.msrb.mxu0 %v5481_v31 }
  0x49   :  { %861 = vmatpush.msrb.mxu1 %v5459_v14  ;;  %892 = vmatpush.msra.mxu2 %v5308_v18 }
  0x4a   :  { %807 = vmatpush.msrb.mxu3 %v5500_v40  ;;  %834 = vmatpush.msrb.mxu0 %v5494_v37 }
  0x4b   :  { %863 = vmatpush.msrb.mxu1 %v5473_v24  ;;  %894 = vmatpush.msra.mxu2 %v5317_v22 }
  0x4c   :  { %921 = vmatpush.msra.mxu3 %v5347_v43  ;;  %838 = vmatpush.msrb.mxu0 %v5511_v46 }
  0x4d   :  { %865 = vmatpush.msrb.mxu1 %v5486_v33 }
  0x4e   :  { %927 = vmatpush.msra.mxu3 %v5349_v44  ;;  %842 = vmatpush.msrb.mxu0 %v5529_v61 }
  0x4f   :  { %867 = vmatpush.msrb.mxu1 %v5500_v40 }
  0x50   :  { %933 = vmatpush.msra.mxu3 %v5356_v47 }
  0x52   :  { %939 = vmatpush.msra.mxu3 %v5362_v48 }
  0x98   :  { %v5451_v9 = vpop.f32.mrf.mxu0 }
  0x99   :  { %v5462_v16 = vpop.f32.mrf.mxu1  ;;  %v5464_v17 = vpop.f32.mrf.mxu2  ;;  %v144_v35 = vadd.f32 %v5069_v13, %v5451_v9 }
  0x9a   :  { %v5475_v25 = vpop.f32.mrf.mxu3 }
  0x9b   :  { %v183_v9 = vadd.f32 %v5462_v16, %v144_v35 }
  0x9d   :  { %v213_v8 = vadd.f32 %v5464_v17, %v183_v9 }
  0xa0   :  { %v5503_v41 = vpop.f32.mrf.mxu0 }
  0xa1   :  { %6201 = vst [vmem:[#allocation19_spill] sm:$0xff] %v5503_v41  ;;  %v5518_v51 = vpop.f32.mrf.mxu1 }
  0xa2   :  { %6204 = vst [vmem:[#allocation22_spill] sm:$0xff] %v5518_v51  ;;  %v5520_v53 = vpop.f32.mrf.mxu2  ;;  %v5531_v2 = vpop.f32.mrf.mxu3  ;;  %v243_v51 = vadd.f32 %v5475_v25, %v213_v8 }
  0xa3   :  { %6205 = vst [vmem:[#allocation23_spill] sm:$0xff] %v5520_v53 }
  0xa4   :  { %6208 = vst [vmem:[#allocation26_spill] sm:$0xff] %v5531_v2 }
  0xa8   :  { %v275_v27 = vpop.f32.mrf.mxu0 }
  0xa9   :  { %v302_v50 = vpop.f32.mrf.mxu1  ;;  %v276_v41 = vadd.f32 %v275_v27, %v243_v51 }
  0xaa   :  { %v339_v36 = vpop.f32.mrf.mxu2  ;;  %v380_v45 = vpop.f32.mrf.mxu3 }
  0xab   :  { %v381_v13 = vadd.f32 %v380_v45, %v339_v36  ;;  %v5579_v61 = vadd.f32 %v302_v50, %v276_v41 }
  0xb0   :  { %v5570_v60 = vpop.f32.mrf.mxu0 }
  0xb1   :  { %6211 = vst [vmem:[#allocation29_spill] sm:$0xff] %v5570_v60  ;;  %v5575_v16 = vpop.f32.mrf.mxu1 }
  0xb2   :  { %6212 = vst [vmem:[#allocation30_spill] sm:$0xff] %v5575_v16  ;;  %v410_v35 = vpop.f32.mrf.mxu2  ;;  %v437_v53 = vpop.f32.mrf.mxu3 }
  0xb3   :  { %v411_v2 = vadd.f32 %v410_v35, %v381_v13 }
  0xb5   :  { %v438_v49 = vadd.f32 %v437_v53, %v411_v2 }
  0xb8   :  { %v470_v39 = vpop.f32.mrf.mxu0 }
  0xb9   :  { %v471_v60 = vadd.f32 %v470_v39, %v438_v49  ;;  %v495_v44 = vpop.f32.mrf.mxu1 }
  0xba   :  { %v526_v41 = vpop.f32.mrf.mxu2 }
  0xbb   :  { %v496_v17 = vadd.f32 %v495_v44, %v471_v60 }
  0xbc   :  { %v567_v49 = vpop.f32.mrf.mxu3 }
  0xbd   :  { %v498_v36 = vadd.f32 %v496_v17, %v5579_v61  ;;  %v568_v51 = vadd.f32 %v567_v49, %v526_v41  ;;  %v5634_v41 = vld [vmem:[%s6163_s6] ss:$0 sm:$0xff] }
  0xbf   :  { %5072 = vtanh.f32 %v498_v36 }
  0xc0   :  { %v597_v53 = vpop.f32.mrf.mxu0 }
  0xc1   :  { %v598_v2 = vadd.f32 %v597_v53, %v568_v51  ;;  %v624_v27 = vpop.f32.mrf.mxu1 }
  0xc2   :  { %v657_v50 = vpop.f32.mrf.mxu2 }
  0xc3   :  { %v625_v60 = vadd.f32 %v624_v27, %v598_v2 }
  0xc5   :  { %v5073_v45 = vpop.eup %5072  ;;  %v658_v17 = vadd.f32 %v657_v50, %v625_v60 }
  0xc6   :  { %v686_v9 = vsel %vm309_vm1, %v5073_v45, 0  ;;  %v682_v8 = vpop.f32.mrf.mxu3 }
  0xc7   :  { %v708_v13 = vand.u32 4294901760, %v686_v9  ;;  %v683_v45 = vadd.f32 %v682_v8, %v658_v17 }
  0xc9   :  { %754 = vmatmul.f32.vlgmr.msra.gmra.mxu1 %v708_v13  ;;  %v709_v35 = vsub.f32 %v686_v9, %v708_v13 }
  0xca   :  { %988 = vmatpush.msra.mxu1 %v5292_v10 }
  0xcb   :  { %784 = vmatmul.f32.vlgmr.msrb.gmra.mxu2 %v709_v35  ;;  %v710_v25 = vand.u32 4294901760, %v709_v35 }
  0xcc   :  { %990 = vmatpush.msra.mxu1 %v5294_v11  ;;  %1017 = vmatpush.msrb.mxu2 %v5326_v28 }
  0xcd   :  { %811 = vmatmul.f32.vlgmr.msrb.gmra.mxu3 %v710_v25  ;;  %v711_v44 = vsub.f32 %v709_v35, %v710_v25 }
  0xce   :  { %992 = vmatpush.msra.mxu1 %v5308_v18  ;;  %1021 = vmatpush.msrb.mxu2 %v5329_v29 }
  0xcf   :  { %v712_v39 = vand.u32 4294901760, %v711_v44  ;;  %1048 = vmatpush.msrb.mxu3 %v5292_v10 }
  0xd0   :  { %994 = vmatpush.msra.mxu1 %v5317_v22  ;;  %1025 = vmatpush.msrb.mxu2 %v5335_v34 }
  0xd1   :  { %713 = vmatmul.f32.vlgmr.msra.gmra.mxu0 %v712_v39  ;;  %869 = vmatmul.f32.vlgmr.msrb.gmra.mxu1 %v708_v13 }
  0xd2   :  { %1050 = vmatpush.msrb.mxu3 %v5294_v11  ;;  %959 = vmatpush.msra.mxu0 %v5312_v20 }
  0xd3   :  { %900 = vmatmul.f32.vlgmr.msra.gmra.mxu2 %v712_v39  ;;  %1114 = vmatpush.msrb.mxu1 %v5427_v1 }
  0xd4   :  { %1029 = vmatpush.msrb.mxu2 %v5342_v38  ;;  %1052 = vmatpush.msrb.mxu3 %v5308_v18 }
  0xd5   :  { %941 = vmatmul.f32.vlgmr.msra.gmra.mxu3 %v708_v13  ;;  %962 = vmatpush.msra.mxu0 %v5315_v21 }
  0xd6   :  { %1054 = vmatpush.msrb.mxu3 %v5317_v22  ;;  %1120 = vmatpush.msrb.mxu1 %v5442_v5 }
  0xd7   :  { %965 = vmatpush.msra.mxu0 %v5322_v26  ;;  %1152 = vmatpush.msra.mxu2 %v5400_v55 }
  0xd8   :  { %1126 = vmatpush.msrb.mxu1 %v5454_v12  ;;  %1181 = vmatpush.msra.mxu3 %v5394_v52 }
  0xd9   :  { %844 = vmatmul.f32.vlgmr.msrb.gmra.mxu0 %v708_v13  ;;  %998 = vmatmul.f32.vlgmr.msra.gmra.mxu1 %v710_v25 }
  0xda   :  { %968 = vmatpush.msra.mxu0 %v5332_v30  ;;  %1155 = vmatpush.msra.mxu2 %v5410_v59 }
  0xdb   :  { %1031 = vmatmul.f32.vlgmr.msrb.gmra.mxu2 %v708_v13  ;;  %1132 = vmatpush.msrb.mxu1 %v5467_v19 }
  0xdc   :  { %1158 = vmatpush.msra.mxu2 %v5423_v0  ;;  %1183 = vmatpush.msra.mxu3 %v5397_v54 }
  0xdd   :  { %1056 = vmatmul.f32.vlgmr.msrb.gmra.mxu3 %v708_v13  ;;  %1081 = vmatpush.msrb.mxu0 %v5394_v52 }
  0xde   :  { %1161 = vmatpush.msra.mxu2 %v5436_v4  ;;  %1185 = vmatpush.msra.mxu3 %v5407_v58 }
  0xdf   :  { %1241 = vmatpush.msra.mxu1 %v5394_v52  ;;  %1083 = vmatpush.msrb.mxu0 %v5397_v54 }
  0xe0   :  { %1187 = vmatpush.msra.mxu3 %v5420_v63  ;;  %1270 = vmatpush.msrb.mxu2 %v5459_v14 }
  0xe1   :  { %971 = vmatmul.f32.vlgmr.msra.gmra.mxu0 %v709_v35  ;;  %1243 = vmatpush.msra.mxu1 %v5397_v54 }
  0xe2   :  { %1085 = vmatpush.msrb.mxu0 %v5407_v58  ;;  %1303 = vmatpush.msrb.mxu3 %v5506_v42 }
  0xe3   :  { %1245 = vmatpush.msra.mxu1 %v5407_v58  ;;  %1272 = vmatpush.msrb.mxu2 %v5473_v24 }
  0xe4   :  { %1087 = vmatpush.msrb.mxu0 %v5420_v63  ;;  %1309 = vmatpush.msrb.mxu3 %v5524_v56 }
  0xe5   :  { %1247 = vmatpush.msra.mxu1 %v5420_v63  ;;  %1274 = vmatpush.msrb.mxu2 %v5486_v33 }
  0xe6   :  { %1210 = vmatpush.msra.mxu0 %v5405_v57  ;;  %1315 = vmatpush.msrb.mxu3 %v5537_v6 }
  0xe7   :  { %1276 = vmatpush.msrb.mxu2 %v5500_v40 }
  0xe8   :  { %1214 = vmatpush.msra.mxu0 %v5418_v62  ;;  %1321 = vmatpush.msrb.mxu3 %v5548_v15 }
  0xea   :  { %1218 = vmatpush.msra.mxu0 %v5433_v3 }
  0xec   :  { %1222 = vmatpush.msra.mxu0 %v5447_v7 }
 0x146   :  { %v755_v36 = vpop.f32.mrf.mxu1 }
 0x14e   :  { %v714_v9 = vpop.f32.mrf.mxu0  ;;  %v785_v13 = vpop.f32.mrf.mxu2 }
 0x14f   :  { %v715_v35 = vadd.f32 %v714_v9, %v683_v45  ;;  %v870_v7 = vpop.f32.mrf.mxu1 }
 0x150   :  { %v812_v25 = vpop.f32.mrf.mxu3 }
 0x151   :  { %v756_v44 = vadd.f32 %v755_v36, %v715_v35 }
 0x153   :  { %v786_v39 = vadd.f32 %v785_v13, %v756_v44 }
 0x155   :  { %v813_v16 = vadd.f32 %v812_v25, %v786_v39 }
 0x156   :  { %v845_v15 = vpop.f32.mrf.mxu0  ;;  %v901_v51 = vpop.f32.mrf.mxu2 }
 0x157   :  { %v846_v49 = vadd.f32 %v845_v15, %v813_v16  ;;  %v999_v17 = vpop.f32.mrf.mxu1 }
 0x158   :  { %v942_v2 = vpop.f32.mrf.mxu3 }
 0x159   :  { %v871_v53 = vadd.f32 %v870_v7, %v846_v49  ;;  %v943_v50 = vadd.f32 %v942_v2, %v901_v51 }
 0x15b   :  { %v873_v27 = vadd.f32 %v5634_v41, %v871_v53 }
 0x15d   :  { %5074 = vtanh.f32 %v873_v27 }
 0x15e   :  { %v972_v60 = vpop.f32.mrf.mxu0  ;;  %v1032_v45 = vpop.f32.mrf.mxu2 }
 0x15f   :  { %v973_v8 = vadd.f32 %v972_v60, %v943_v50  ;;  %v6213_v50 = vld [vmem:[#allocation12_spill] sm:$0xff]  ;;  %v6214_v60 = vld [vmem:[#allocation25_spill] sm:$0xff] }
 0x160   :  { %v1057_v35 = vpop.f32.mrf.mxu3 }
 0x161   :  { %v1000_v36 = vadd.f32 %v999_v17, %v973_v8  ;;  %v6215_v17 = vld [vmem:[#allocation18_spill] sm:$0xff] }
 0x163   :  { %v5075_v9 = vpop.eup %5074  ;;  %v1033_v13 = vadd.f32 %v1032_v45, %v1000_v36  ;;  %v6216_v45 = vld [vmem:[#allocation21_spill] sm:$0xff] }
 0x164   :  { %v1066_v25 = vsel %vm309_vm1, %v5075_v9, 0 }
 0x165   :  { %v1058_v44 = vadd.f32 %v1057_v35, %v1033_v13  ;;  %v1088_v39 = vand.u32 4294901760, %v1066_v25 }
 0x167   :  { %v1061_v15 = vrot.slane %v1058_v44, 6  ;;  %1134 = vmatmul.f32.vlgmr.msrb.gmra.mxu1 %v1088_v39  ;;  %v1089_v7 = vsub.f32 %v1066_v25, %v1088_v39  ;;  %v6217_v44 = vld [vmem:[#allocation28_spill] sm:$0xff] }
 0x168   :  { %1370 = vmatpush.msrb.mxu1 %v5459_v14 }
 0x169   :  { %v1063_v16 = vadd.f32 %v1061_v15, %v5579_v61  ;;  %1164 = vmatmul.f32.vlgmr.msra.gmra.mxu2 %v1089_v7  ;;  %v1090_v49 = vand.u32 4294901760, %v1089_v7 }
 0x16a   :  { %1372 = vmatpush.msrb.mxu1 %v5473_v24  ;;  %1399 = vmatpush.msra.mxu2 %v5481_v31 }
 0x16b   :  { %5076 = vtanh.f32 %v1063_v16  ;;  %1191 = vmatmul.f32.vlgmr.msra.gmra.mxu3 %v1090_v49  ;;  %v1091_v51 = vsub.f32 %v1089_v7, %v1090_v49 }
 0x16c   :  { %1374 = vmatpush.msrb.mxu1 %v5486_v33  ;;  %1430 = vmatpush.msra.mxu3 %v5459_v14 }
 0x16d   :  { %v1092_v53 = vand.u32 4294901760, %v1091_v51  ;;  %1403 = vmatpush.msra.mxu2 %v5494_v37 }
 0x16e   :  { %1376 = vmatpush.msrb.mxu1 %v5500_v40  ;;  %1432 = vmatpush.msra.mxu3 %v5473_v24 }
 0x16f   :  { %1093 = vmatmul.f32.vlgmr.msrb.gmra.mxu0 %v1092_v53  ;;  %1249 = vmatmul.f32.vlgmr.msra.gmra.mxu1 %v1088_v39 }
 0x170   :  { %1341 = vmatpush.msrb.mxu0 %v5471_v23  ;;  %1434 = vmatpush.msra.mxu3 %v5486_v33 }
 0x171   :  { %v5077_v2 = vpop.eup %5076  ;;  %1490 = vmatpush.msra.mxu1 %v5347_v43  ;;  %1407 = vmatpush.msra.mxu2 %v5511_v46 }
 0x172   :  { %v1254_v27 = vrot.slane %v5077_v2, 2  ;;  %1344 = vmatpush.msrb.mxu0 %v5484_v32  ;;  %1436 = vmatpush.msra.mxu3 %v5500_v40 }
 0x173   :  { %1496 = vmatpush.msra.mxu1 %v6213_v50  ;;  %1411 = vmatpush.msra.mxu2 %v6214_v60 }
 0x174   :  { %v1255_v8 = vsel %vm309_vm1, %v1254_v27, 0  ;;  %1347 = vmatpush.msrb.mxu0 %v6215_v17 }
 0x175   :  { %v1277_v36 = vand.u32 4294901760, %v1255_v8  ;;  %1502 = vmatpush.msra.mxu1 %v5356_v47 }
 0x176   :  { %1350 = vmatpush.msrb.mxu0 %v6216_v45 }
 0x177   :  { %v1278_v9 = vsub.f32 %v1255_v8, %v1277_v36  ;;  %1224 = vmatmul.f32.vlgmr.msra.gmra.mxu0 %v1088_v39  ;;  %1323 = vmatmul.f32.vlgmr.msrb.gmra.mxu3 %v1277_v36  ;;  %v6218_v39 = vld [vmem:[#allocation17_spill] sm:$0xff] }
 0x178   :  { %1457 = vmatpush.msra.mxu0 %v5292_v10  ;;  %1557 = vmatpush.msrb.mxu3 %v5292_v10 }
 0x179   :  { %v1279_v13 = vand.u32 4294901760, %v1278_v9  ;;  %1508 = vmatpush.msra.mxu1 %v5362_v48 }
 0x17a   :  { %1459 = vmatpush.msra.mxu0 %v5294_v11  ;;  %1559 = vmatpush.msrb.mxu3 %v5294_v11 }
 0x17b   :  { %1380 = vmatmul.f32.vlgmr.msrb.gmra.mxu1 %v1279_v13  ;;  %v1280_v35 = vsub.f32 %v1278_v9, %v1279_v13 }
 0x17c   :  { %1461 = vmatpush.msra.mxu0 %v5308_v18  ;;  %1561 = vmatpush.msrb.mxu3 %v5308_v18 }
 0x17d   :  { %v1281_v25 = vand.u32 4294901760, %v1280_v35  ;;  %1617 = vmatpush.msrb.mxu1 %v5292_v10 }
 0x17e   :  { %1463 = vmatpush.msra.mxu0 %v5317_v22  ;;  %1563 = vmatpush.msrb.mxu3 %v5317_v22 }
 0x17f   :  { %1282 = vmatmul.f32.vlgmr.msrb.gmra.mxu2 %v1281_v25  ;;  %1353 = vmatmul.f32.vlgmr.msrb.gmra.mxu0 %v1278_v9 }
 0x180   :  { %1438 = vmatmul.f32.vlgmr.msra.gmra.mxu3 %v1277_v36  ;;  %1619 = vmatpush.msrb.mxu1 %v5294_v11 }
 0x181   :  { %1528 = vmatpush.msrb.mxu2 %v5312_v20  ;;  %1586 = vmatpush.msrb.mxu0 %v5326_v28 }
 0x182   :  { %1621 = vmatpush.msrb.mxu1 %v5308_v18  ;;  %1683 = vmatpush.msra.mxu3 %v5427_v1 }
 0x183   :  { %1510 = vmatmul.f32.vlgmr.msra.gmra.mxu1 %v1277_v36  ;;  %1531 = vmatpush.msrb.mxu2 %v5315_v21 }
 0x184   :  { %1590 = vmatpush.msrb.mxu0 %v5329_v29  ;;  %1623 = vmatpush.msrb.mxu1 %v5317_v22 }
 0x185   :  { %1534 = vmatpush.msrb.mxu2 %v5322_v26  ;;  %1689 = vmatpush.msra.mxu3 %v5442_v5 }
 0x186   :  { %1594 = vmatpush.msrb.mxu0 %v5335_v34  ;;  %1750 = vmatpush.msra.mxu1 %v5394_v52 }
 0x187   :  { %1413 = vmatmul.f32.vlgmr.msra.gmra.mxu2 %v1277_v36  ;;  %1469 = vmatmul.f32.vlgmr.msra.gmra.mxu0 %v1281_v25 }
 0x188   :  { %1567 = vmatmul.f32.vlgmr.msrb.gmra.mxu3 %v1279_v13  ;;  %1537 = vmatpush.msrb.mxu2 %v5332_v30 }
 0x189   :  { %1598 = vmatpush.msrb.mxu0 %v5342_v38  ;;  %1695 = vmatpush.msra.mxu3 %v5454_v12 }
 0x18a   :  { %1752 = vmatpush.msra.mxu1 %v5397_v54  ;;  %1650 = vmatpush.msra.mxu2 %v5394_v52 }
 0x18b   :  { %1721 = vmatpush.msra.mxu0 %v5400_v55  ;;  %1625 = vmatmul.f32.vlgmr.msrb.gmra.mxu1 %v1277_v36 }
 0x18c   :  { %1701 = vmatpush.msra.mxu3 %v5467_v19  ;;  %1754 = vmatpush.msra.mxu1 %v5407_v58 }
 0x18d   :  { %1724 = vmatpush.msra.mxu0 %v5410_v59  ;;  %1652 = vmatpush.msra.mxu2 %v5397_v54 }
 0x18e   :  { %1810 = vmatpush.msrb.mxu3 %v5394_v52  ;;  %1756 = vmatpush.msra.mxu1 %v5420_v63 }
 0x18f   :  { %1727 = vmatpush.msra.mxu0 %v5423_v0  ;;  %1540 = vmatmul.f32.vlgmr.msrb.gmra.mxu2 %v1278_v9 }
 0x190   :  { %1600 = vmatmul.f32.vlgmr.msrb.gmra.mxu0 %v1277_v36  ;;  %1812 = vmatpush.msrb.mxu3 %v5397_v54 }
 0x191   :  { %1730 = vmatpush.msra.mxu0 %v5436_v4  ;;  %1654 = vmatpush.msra.mxu2 %v5407_v58 }
 0x192   :  { %1872 = vmatpush.msrb.mxu1 %v5506_v42  ;;  %1814 = vmatpush.msrb.mxu3 %v5407_v58 }
 0x193   :  { %1839 = vmatpush.msrb.mxu0 %v5459_v14  ;;  %1656 = vmatpush.msra.mxu2 %v5420_v63 }
 0x194   :  { %1878 = vmatpush.msrb.mxu1 %v5524_v56  ;;  %1816 = vmatpush.msrb.mxu3 %v5420_v63 }
 0x195   :  { %1779 = vmatpush.msrb.mxu2 %v5405_v57  ;;  %1841 = vmatpush.msrb.mxu0 %v5473_v24 }
 0x196   :  { %1884 = vmatpush.msrb.mxu1 %v5537_v6 }
 0x197   :  { %1783 = vmatpush.msrb.mxu2 %v5418_v62  ;;  %1843 = vmatpush.msrb.mxu0 %v5486_v33 }
 0x198   :  { %1890 = vmatpush.msrb.mxu1 %v6217_v44 }
 0x199   :  { %1787 = vmatpush.msrb.mxu2 %v5433_v3  ;;  %1845 = vmatpush.msrb.mxu0 %v5500_v40 }
 0x19b   :  { %1791 = vmatpush.msrb.mxu2 %v6218_v39 }
 0x1e4   :  { %v1135_v7 = vpop.f32.mrf.mxu1 }
 0x1ec   :  { %v1094_v15 = vpop.f32.mrf.mxu0  ;;  %v1165_v49 = vpop.f32.mrf.mxu2 }
 0x1ed   :  { %v1136_v16 = vadd.f32 %v1135_v7, %v1094_v15  ;;  %v1250_v8 = vpop.f32.mrf.mxu1 }
 0x1ee   :  { %v1192_v53 = vpop.f32.mrf.mxu3 }
 0x1ef   :  { %v1166_v51 = vadd.f32 %v1165_v49, %v1136_v16 }
 0x1f1   :  { %v1193_v27 = vadd.f32 %v1192_v53, %v1166_v51 }
 0x1f4   :  { %v1225_v2 = vpop.f32.mrf.mxu0 }
 0x1f5   :  { %v1226_v36 = vadd.f32 %v1225_v2, %v1193_v27 }
 0x1f7   :  { %v1251_v13 = vadd.f32 %v1250_v8, %v1226_v36 }
 0x1f8   :  { %v1381_v44 = vpop.f32.mrf.mxu1 }
 0x1fa   :  { %v1324_v9 = vpop.f32.mrf.mxu3 }
 0x1fc   :  { %v1354_v35 = vpop.f32.mrf.mxu0 }
 0x200   :  { %v1511_v16 = vpop.f32.mrf.mxu1 }
 0x202   :  { %v1283_v25 = vpop.f32.mrf.mxu2 }
 0x203   :  { %v1284_v3 = vadd.f32 %v1283_v25, %v1251_v13  ;;  %v1439_v39 = vpop.f32.mrf.mxu3 }
 0x204   :  { %v1470_v15 = vpop.f32.mrf.mxu0 }
 0x205   :  { %v1325_v6 = vadd.f32 %v1324_v9, %v1284_v3  ;;  %v1512_v51 = vadd.f32 %v1511_v16, %v1470_v15 }
 0x207   :  { %v1355_v62 = vadd.f32 %v1354_v35, %v1325_v6 }
 0x208   :  { %v1626_v3 = vpop.f32.mrf.mxu1 }
 0x209   :  { %v1382_v56 = vadd.f32 %v1381_v44, %v1355_v62 }
 0x20a   :  { %v1414_v57 = vpop.f32.mrf.mxu2 }
 0x20b   :  { %v1415_v42 = vadd.f32 %v1414_v57, %v1382_v56  ;;  %v1568_v27 = vpop.f32.mrf.mxu3 }
 0x20d   :  { %v1440_v7 = vadd.f32 %v1439_v39, %v1415_v42  ;;  %v1601_v36 = vpop.f32.mrf.mxu0 }
 0x20f   :  { %v1442_v49 = vadd.f32 %v5634_v41, %v1440_v7 }
 0x211   :  { %5078 = vtanh.f32 %v1442_v49 }
 0x212   :  { %v1541_v53 = vpop.f32.mrf.mxu2 }
 0x213   :  { %v1542_v2 = vadd.f32 %v1541_v53, %v1512_v51 }
 0x215   :  { %v1569_v8 = vadd.f32 %v1568_v27, %v1542_v2 }
 0x217   :  { %v5079_v13 = vpop.eup %5078  ;;  %v1602_v25 = vadd.f32 %v1601_v36, %v1569_v8  ;;  %v6219_v8 = vld [vmem:[#allocation20_spill] sm:$0xff]  ;;  %v6220_v36 = vld [vmem:[#allocation13_spill] sm:$0xff] }
 0x218   :  { %v1635_v62 = vsel %vm309_vm1, %v5079_v13, 0  ;;  %v6221_v13 = vld [vmem:[#allocation24_spill] sm:$0xff] }
 0x219   :  { %v1627_v6 = vadd.f32 %v1626_v3, %v1602_v25  ;;  %v1657_v44 = vand.u32 4294901760, %v1635_v62  ;;  %v6222_v25 = vld [vmem:[#allocation14_spill] sm:$0xff]  ;;  %v6223_v3 = vld [vmem:[#allocation27_spill] sm:$0xff] }
 0x21b   :  { %v1630_v57 = vrot.slane %v1627_v6, 4  ;;  %1703 = vmatmul.f32.vlgmr.msra.gmra.mxu3 %v1657_v44  ;;  %v1658_v42 = vsub.f32 %v1635_v62, %v1657_v44  ;;  %v6224_v62 = vld [vmem:[#allocation16_spill] sm:$0xff] }
 0x21c   :  { %1939 = vmatpush.msra.mxu3 %v5459_v14  ;;  %v6225_v6 = vld [vmem:[#allocation28_spill] sm:$0xff] }
 0x21d   :  { %v1632_v56 = vadd.f32 %v1630_v57, %v5579_v61  ;;  %1733 = vmatmul.f32.vlgmr.msra.gmra.mxu0 %v1658_v42  ;;  %v1659_v39 = vand.u32 4294901760, %v1658_v42 }
 0x21e   :  { %1941 = vmatpush.msra.mxu3 %v5473_v24  ;;  %1968 = vmatpush.msra.mxu0 %v5481_v31 }
 0x21f   :  { %5080 = vtanh.f32 %v1632_v56  ;;  %1760 = vmatmul.f32.vlgmr.msra.gmra.mxu1 %v1659_v39  ;;  %v1660_v9 = vsub.f32 %v1658_v42, %v1659_v39 }
 0x220   :  { %1943 = vmatpush.msra.mxu3 %v5486_v33  ;;  %1999 = vmatpush.msra.mxu1 %v5459_v14 }
 0x221   :  { %v1661_v35 = vand.u32 4294901760, %v1660_v9  ;;  %1972 = vmatpush.msra.mxu0 %v5494_v37 }
 0x222   :  { %1945 = vmatpush.msra.mxu3 %v5500_v40  ;;  %2001 = vmatpush.msra.mxu1 %v5473_v24 }
 0x223   :  { %1662 = vmatmul.f32.vlgmr.msra.gmra.mxu2 %v1661_v35  ;;  %1818 = vmatmul.f32.vlgmr.msrb.gmra.mxu3 %v1657_v44 }
 0x224   :  { %1910 = vmatpush.msra.mxu2 %v5471_v23  ;;  %2003 = vmatpush.msra.mxu1 %v5486_v33 }
 0x225   :  { %v5081_v15 = vpop.eup %5080  ;;  %2059 = vmatpush.msrb.mxu3 %v5347_v43  ;;  %1976 = vmatpush.msra.mxu0 %v5511_v46 }
 0x226   :  { %v1823_v7 = vrot.slane %v5081_v15, 4  ;;  %1913 = vmatpush.msra.mxu2 %v5484_v32  ;;  %2005 = vmatpush.msra.mxu1 %v5500_v40 }
 0x227   :  { %2065 = vmatpush.msrb.mxu3 %v6213_v50  ;;  %1980 = vmatpush.msra.mxu0 %v6214_v60 }
 0x228   :  { %v1824_v16 = vsel %vm309_vm1, %v1823_v7, 0  ;;  %1916 = vmatpush.msra.mxu2 %v6215_v17 }
 0x229   :  { %v1846_v49 = vand.u32 4294901760, %v1824_v16  ;;  %2071 = vmatpush.msrb.mxu3 %v5356_v47 }
 0x22a   :  { %1919 = vmatpush.msra.mxu2 %v6216_v45 }
 0x22b   :  { %1793 = vmatmul.f32.vlgmr.msrb.gmra.mxu2 %v1657_v44  ;;  %1892 = vmatmul.f32.vlgmr.msrb.gmra.mxu1 %v1846_v49  ;;  %v1847_v51 = vsub.f32 %v1824_v16, %v1846_v49  ;;  %v6226_v44 = vld [vmem:[#allocation17_spill] sm:$0xff] }
 0x22c   :  { %2026 = vmatpush.msrb.mxu2 %v5292_v10  ;;  %2126 = vmatpush.msrb.mxu1 %v5292_v10 }
 0x22d   :  { %v1848_v53 = vand.u32 4294901760, %v1847_v51  ;;  %2077 = vmatpush.msrb.mxu3 %v5362_v48 }
 0x22e   :  { %2028 = vmatpush.msrb.mxu2 %v5294_v11  ;;  %2128 = vmatpush.msrb.mxu1 %v5294_v11 }
 0x22f   :  { %1949 = vmatmul.f32.vlgmr.msra.gmra.mxu3 %v1848_v53  ;;  %v1849_v2 = vsub.f32 %v1847_v51, %v1848_v53 }
 0x230   :  { %2030 = vmatpush.msrb.mxu2 %v5308_v18  ;;  %2130 = vmatpush.msrb.mxu1 %v5308_v18 }
 0x231   :  { %v1850_v27 = vand.u32 4294901760, %v1849_v2  ;;  %2186 = vmatpush.msra.mxu3 %v5292_v10 }
 0x232   :  { %2032 = vmatpush.msrb.mxu2 %v5317_v22  ;;  %2132 = vmatpush.msrb.mxu1 %v5317_v22 }
 0x233   :  { %1851 = vmatmul.f32.vlgmr.msrb.gmra.mxu0 %v1850_v27  ;;  %1922 = vmatmul.f32.vlgmr.msra.gmra.mxu2 %v1847_v51 }
 0x234   :  { %2007 = vmatmul.f32.vlgmr.msra.gmra.mxu1 %v1846_v49  ;;  %2188 = vmatpush.msra.mxu3 %v5294_v11 }
 0x235   :  { %2155 = vmatpush.msra.mxu2 %v5326_v28  ;;  %2097 = vmatpush.msrb.mxu0 %v5312_v20 }
 0x236   :  { %2190 = vmatpush.msra.mxu3 %v5308_v18  ;;  %2252 = vmatpush.msra.mxu1 %v5427_v1 }
 0x237   :  { %2079 = vmatmul.f32.vlgmr.msrb.gmra.mxu3 %v1846_v49  ;;  %2159 = vmatpush.msra.mxu2 %v5329_v29 }
 0x238   :  { %2100 = vmatpush.msrb.mxu0 %v5315_v21  ;;  %2192 = vmatpush.msra.mxu3 %v5317_v22 }
 0x239   :  { %2163 = vmatpush.msra.mxu2 %v5335_v34  ;;  %2258 = vmatpush.msra.mxu1 %v5442_v5 }
 0x23a   :  { %2103 = vmatpush.msrb.mxu0 %v5322_v26  ;;  %2319 = vmatpush.msrb.mxu3 %v5394_v52 }
 0x23b   :  { %1982 = vmatmul.f32.vlgmr.msra.gmra.mxu0 %v1846_v49  ;;  %2038 = vmatmul.f32.vlgmr.msrb.gmra.mxu2 %v1850_v27 }
 0x23c   :  { %2136 = vmatmul.f32.vlgmr.msrb.gmra.mxu1 %v1848_v53  ;;  %2167 = vmatpush.msra.mxu2 %v5342_v38 }
 0x23d   :  { %2106 = vmatpush.msrb.mxu0 %v5332_v30  ;;  %2264 = vmatpush.msra.mxu1 %v5454_v12 }
 0x23e   :  { %2290 = vmatpush.msrb.mxu2 %v5400_v55  ;;  %2321 = vmatpush.msrb.mxu3 %v5397_v54 }
 0x23f   :  { %2194 = vmatmul.f32.vlgmr.msra.gmra.mxu3 %v1846_v49  ;;  %2270 = vmatpush.msra.mxu1 %v5467_v19 }
 0x240   :  { %2293 = vmatpush.msrb.mxu2 %v5410_v59  ;;  %2219 = vmatpush.msra.mxu0 %v5394_v52 }
 0x241   :  { %2323 = vmatpush.msrb.mxu3 %v5407_v58  ;;  %2379 = vmatpush.msrb.mxu1 %v5394_v52 }
 0x242   :  { %2296 = vmatpush.msrb.mxu2 %v5423_v0  ;;  %2221 = vmatpush.msra.mxu0 %v5397_v54 }
 0x243   :  { %2109 = vmatmul.f32.vlgmr.msrb.gmra.mxu0 %v1847_v51  ;;  %2169 = vmatmul.f32.vlgmr.msra.gmra.mxu2 %v1846_v49 }
 0x244   :  { %2299 = vmatpush.msrb.mxu2 %v5436_v4  ;;  %2325 = vmatpush.msrb.mxu3 %v5420_v63 }
 0x245   :  { %2381 = vmatpush.msrb.mxu1 %v5397_v54  ;;  %2223 = vmatpush.msra.mxu0 %v5407_v58 }
 0x246   :  { %2441 = vmatpush.msra.mxu3 %v6219_v8  ;;  %2408 = vmatpush.msra.mxu2 %v5459_v14 }
 0x247   :  { %2383 = vmatpush.msrb.mxu1 %v5407_v58  ;;  %2225 = vmatpush.msra.mxu0 %v5420_v63 }
 0x248   :  { %2447 = vmatpush.msra.mxu3 %v6221_v13  ;;  %2410 = vmatpush.msra.mxu2 %v5473_v24 }
 0x249   :  { %2348 = vmatpush.msrb.mxu0 %v6220_v36  ;;  %2385 = vmatpush.msrb.mxu1 %v5420_v63 }
 0x24a   :  { %2453 = vmatpush.msra.mxu3 %v6223_v3  ;;  %2412 = vmatpush.msra.mxu2 %v5486_v33 }
 0x24b   :  { %2352 = vmatpush.msrb.mxu0 %v6222_v25 }
 0x24c   :  { %2459 = vmatpush.msra.mxu3 %v6225_v6  ;;  %2414 = vmatpush.msra.mxu2 %v5500_v40 }
 0x24d   :  { %2356 = vmatpush.msrb.mxu0 %v6224_v62 }
 0x24f   :  { %2360 = vmatpush.msrb.mxu0 %v6226_v44 }
 0x29a   :  { %v1734_v39 = vpop.f32.mrf.mxu0 }
 0x29c   :  { %v1761_v9 = vpop.f32.mrf.mxu1 }
 0x29e   :  { %v1704_v57 = vpop.f32.mrf.mxu3 }
 0x2a6   :  { %v1663_v42 = vpop.f32.mrf.mxu2  ;;  %v1819_v15 = vpop.f32.mrf.mxu3 }
 0x2a7   :  { %v1705_v56 = vadd.f32 %v1704_v57, %v1663_v42 }
 0x2a8   :  { %v1893_v51 = vpop.f32.mrf.mxu1 }
 0x2a9   :  { %v1735_v35 = vadd.f32 %v1734_v39, %v1705_v56 }
 0x2ab   :  { %v1762_v7 = vadd.f32 %v1761_v9, %v1735_v35 }
 0x2ae   :  { %v1794_v16 = vpop.f32.mrf.mxu2 }
 0x2af   :  { %v1795_v49 = vadd.f32 %v1794_v16, %v1762_v7 }
 0x2b0   :  { %v1852_v53 = vpop.f32.mrf.mxu0 }
 0x2b1   :  { %v1820_v2 = vadd.f32 %v1819_v15, %v1795_v49  ;;  %v2008_v13 = vpop.f32.mrf.mxu1 }
 0x2b2   :  { %v1950_v62 = vpop.f32.mrf.mxu3 }
 0x2b3   :  { %v1853_v27 = vadd.f32 %v1852_v53, %v1820_v2 }
 0x2b5   :  { %v1894_v6 = vadd.f32 %v1893_v51, %v1853_v27 }
 0x2b6   :  { %v1923_v25 = vpop.f32.mrf.mxu2 }
 0x2b7   :  { %v1924_v3 = vadd.f32 %v1923_v25, %v1894_v6 }
 0x2b8   :  { %v1983_v36 = vpop.f32.mrf.mxu0 }
 0x2b9   :  { %v1951_v44 = vadd.f32 %v1950_v62, %v1924_v3  ;;  %v2137_v7 = vpop.f32.mrf.mxu1 }
 0x2ba   :  { %v2080_v42 = vpop.f32.mrf.mxu3 }
 0x2bb   :  { %v1984_v8 = vadd.f32 %v1983_v36, %v1951_v44 }
 0x2bd   :  { %v2009_v57 = vadd.f32 %v2008_v13, %v1984_v8 }
 0x2be   :  { %v2039_v63 = vpop.f32.mrf.mxu2 }
 0x2bf   :  { %v2011_v56 = vadd.f32 %v5634_v41, %v2009_v57  ;;  %v2081_v39 = vadd.f32 %v2080_v42, %v2039_v63 }
 0x2c0   :  { %v2110_v9 = vpop.f32.mrf.mxu0 }
 0x2c1   :  { %5082 = vtanh.f32 %v2011_v56  ;;  %v2111_v35 = vadd.f32 %v2110_v9, %v2081_v39 }
 0x2c2   :  { %v2195_v53 = vpop.f32.mrf.mxu3 }
 0x2c3   :  { %v2138_v15 = vadd.f32 %v2137_v7, %v2111_v35  ;;  %v6227_v35 = vld [vmem:[#allocation15_spill] sm:$0xff]  ;;  %v6228_v7 = vld [vmem:[#allocation20_spill] sm:$0xff] }
 0x2c6   :  { %v2170_v16 = vpop.f32.mrf.mxu2 }
 0x2c7   :  { %v5083_v49 = vpop.eup %5082  ;;  %v2171_v51 = vadd.f32 %v2170_v16, %v2138_v15  ;;  %v6229_v15 = vld [vmem:[#allocation24_spill] sm:$0xff]  ;;  %v6230_v16 = vld [vmem:[#allocation13_spill] sm:$0xff] }
 0x2c8   :  { %v2204_v25 = vsel %vm309_vm1, %v5083_v49, 0  ;;  %v6231_v49 = vld [vmem:[#allocation27_spill] sm:$0xff] }
 0x2c9   :  { %v2196_v3 = vadd.f32 %v2195_v53, %v2171_v51  ;;  %v2226_v62 = vand.u32 4294901760, %v2204_v25  ;;  %v6232_v51 = vld [vmem:[#allocation14_spill] sm:$0xff]  ;;  %v6233_v53 = vld [vmem:[#allocation28_spill] sm:$0xff] }
 0x2cb   :  { %v2199_v36 = vrot.slane %v2196_v3, 2  ;;  %2272 = vmatmul.f32.vlgmr.msra.gmra.mxu1 %v2226_v62  ;;  %v2227_v8 = vsub.f32 %v2204_v25, %v2226_v62  ;;  %v6234_v25 = vld [vmem:[#allocation16_spill] sm:$0xff]  ;;  %v6235_v3 = vld [vmem:[#allocation17_spill] sm:$0xff] }
 0x2cc   :  { %2508 = vmatpush.msra.mxu1 %v5459_v14 }
 0x2cd   :  { %v2201_v63 = vadd.f32 %v2199_v36, %v5579_v61  ;;  %2302 = vmatmul.f32.vlgmr.msrb.gmra.mxu2 %v2227_v8  ;;  %v2228_v13 = vand.u32 4294901760, %v2227_v8 }
 0x2ce   :  { %2510 = vmatpush.msra.mxu1 %v5473_v24  ;;  %2537 = vmatpush.msrb.mxu2 %v5481_v31 }
 0x2cf   :  { %5084 = vtanh.f32 %v2201_v63  ;;  %2329 = vmatmul.f32.vlgmr.msrb.gmra.mxu3 %v2228_v13  ;;  %v2229_v6 = vsub.f32 %v2227_v8, %v2228_v13 }
 0x2d0   :  { %2512 = vmatpush.msra.mxu1 %v5486_v33  ;;  %2568 = vmatpush.msrb.mxu3 %v5459_v14 }
 0x2d1   :  { %v2230_v44 = vand.u32 4294901760, %v2229_v6  ;;  %2541 = vmatpush.msrb.mxu2 %v5494_v37 }
 0x2d2   :  { %2514 = vmatpush.msra.mxu1 %v5500_v40  ;;  %2570 = vmatpush.msrb.mxu3 %v5473_v24 }
 0x2d3   :  { %2231 = vmatmul.f32.vlgmr.msra.gmra.mxu0 %v2230_v44  ;;  %2387 = vmatmul.f32.vlgmr.msrb.gmra.mxu1 %v2226_v62 }
 0x2d4   :  { %2479 = vmatpush.msra.mxu0 %v5471_v23  ;;  %2572 = vmatpush.msrb.mxu3 %v5486_v33 }
 0x2d5   :  { %v5085_v61 = vpop.eup %5084  ;;  %2628 = vmatpush.msrb.mxu1 %v5347_v43  ;;  %2545 = vmatpush.msrb.mxu2 %v5511_v46 }
 0x2d6   :  { %v2392_v2 = vrot.slane %v5085_v61, 6  ;;  %2482 = vmatpush.msra.mxu0 %v5484_v32  ;;  %2574 = vmatpush.msrb.mxu3 %v5500_v40 }
 0x2d7   :  { %2634 = vmatpush.msrb.mxu1 %v6213_v50  ;;  %2549 = vmatpush.msrb.mxu2 %v6214_v60 }
 0x2d8   :  { %v2393_v27 = vsel %vm309_vm1, %v2392_v2, 0  ;;  %2485 = vmatpush.msra.mxu0 %v6215_v17 }
 0x2d9   :  { %v2415_v57 = vand.u32 4294901760, %v2393_v27  ;;  %2640 = vmatpush.msrb.mxu1 %v5356_v47 }
 0x2da   :  { %2488 = vmatpush.msra.mxu0 %v6216_v45 }
 0x2db   :  { %v2416_v42 = vsub.f32 %v2393_v27, %v2415_v57  ;;  %2362 = vmatmul.f32.vlgmr.msrb.gmra.mxu0 %v2226_v62  ;;  %2461 = vmatmul.f32.vlgmr.msra.gmra.mxu3 %v2415_v57 }
 0x2dc   :  { %2595 = vmatpush.msrb.mxu0 %v5292_v10  ;;  %2695 = vmatpush.msra.mxu3 %v5292_v10 }
 0x2dd   :  { %v2417_v56 = vand.u32 4294901760, %v2416_v42  ;;  %2646 = vmatpush.msrb.mxu1 %v5362_v48 }
 0x2de   :  { %2597 = vmatpush.msrb.mxu0 %v5294_v11  ;;  %2697 = vmatpush.msra.mxu3 %v5294_v11 }
 0x2df   :  { %2518 = vmatmul.f32.vlgmr.msra.gmra.mxu1 %v2417_v56  ;;  %v2418_v39 = vsub.f32 %v2416_v42, %v2417_v56 }
 0x2e0   :  { %2599 = vmatpush.msrb.mxu0 %v5308_v18  ;;  %2699 = vmatpush.msra.mxu3 %v5308_v18 }
 0x2e1   :  { %v2419_v9 = vand.u32 4294901760, %v2418_v39  ;;  %2755 = vmatpush.msra.mxu1 %v5292_v10 }
 0x2e2   :  { %2601 = vmatpush.msrb.mxu0 %v5317_v22  ;;  %2701 = vmatpush.msra.mxu3 %v5317_v22 }
 0x2e3   :  { %2420 = vmatmul.f32.vlgmr.msra.gmra.mxu2 %v2419_v9  ;;  %2491 = vmatmul.f32.vlgmr.msra.gmra.mxu0 %v2416_v42 }
 0x2e4   :  { %2576 = vmatmul.f32.vlgmr.msrb.gmra.mxu3 %v2415_v57  ;;  %2757 = vmatpush.msra.mxu1 %v5294_v11 }
 0x2e5   :  { %2666 = vmatpush.msra.mxu2 %v5312_v20  ;;  %2724 = vmatpush.msra.mxu0 %v5326_v28 }
 0x2e6   :  { %2759 = vmatpush.msra.mxu1 %v5308_v18  ;;  %2818 = vmatpush.msrb.mxu3 %v5427_v1 }
 0x2e7   :  { %2648 = vmatmul.f32.vlgmr.msrb.gmra.mxu1 %v2415_v57  ;;  %2669 = vmatpush.msra.mxu2 %v5315_v21 }
 0x2e8   :  { %2728 = vmatpush.msra.mxu0 %v5329_v29  ;;  %2761 = vmatpush.msra.mxu1 %v5317_v22 }
 0x2e9   :  { %2672 = vmatpush.msra.mxu2 %v5322_v26  ;;  %2824 = vmatpush.msrb.mxu3 %v5442_v5 }
 0x2ea   :  { %2732 = vmatpush.msra.mxu0 %v5335_v34  ;;  %2885 = vmatpush.msrb.mxu1 %v5394_v52 }
 0x2eb   :  { %2551 = vmatmul.f32.vlgmr.msrb.gmra.mxu2 %v2415_v57  ;;  %2607 = vmatmul.f32.vlgmr.msrb.gmra.mxu0 %v2419_v9 }
 0x2ec   :  { %2705 = vmatmul.f32.vlgmr.msra.gmra.mxu3 %v2417_v56  ;;  %2675 = vmatpush.msra.mxu2 %v5332_v30 }
 0x2ed   :  { %2736 = vmatpush.msra.mxu0 %v5342_v38  ;;  %2830 = vmatpush.msrb.mxu3 %v5454_v12 }
 0x2ee   :  { %2887 = vmatpush.msrb.mxu1 %v5397_v54  ;;  %2785 = vmatpush.msrb.mxu2 %v5394_v52 }
 0x2ef   :  { %2856 = vmatpush.msrb.mxu0 %v5400_v55  ;;  %2763 = vmatmul.f32.vlgmr.msra.gmra.mxu1 %v2415_v57 }
 0x2f0   :  { %2836 = vmatpush.msrb.mxu3 %v5467_v19  ;;  %2889 = vmatpush.msrb.mxu1 %v5407_v58 }
 0x2f1   :  { %2859 = vmatpush.msrb.mxu0 %v5410_v59  ;;  %2787 = vmatpush.msrb.mxu2 %v5397_v54 }
 0x2f2   :  { %2945 = vmatpush.msra.mxu3 %v5394_v52  ;;  %2891 = vmatpush.msrb.mxu1 %v6227_v35 }
 0x2f3   :  { %2862 = vmatpush.msrb.mxu0 %v5423_v0  ;;  %2678 = vmatmul.f32.vlgmr.msra.gmra.mxu2 %v2416_v42 }
 0x2f4   :  { %2738 = vmatmul.f32.vlgmr.msra.gmra.mxu0 %v2415_v57  ;;  %2947 = vmatpush.msra.mxu3 %v5397_v54 }
 0x2f5   :  { %2865 = vmatpush.msrb.mxu0 %v5436_v4  ;;  %2789 = vmatpush.msrb.mxu2 %v5407_v58 }
 0x2f6   :  { %3006 = vmatpush.msra.mxu1 %v6228_v7  ;;  %2949 = vmatpush.msra.mxu3 %v5407_v58  ;;  %v6239_v7 = vld [vmem:[#allocation26_spill] sm:$0xff] }
 0x2f7   :  { %2973 = vmatpush.msra.mxu0 %v5459_v14  ;;  %2791 = vmatpush.msrb.mxu2 %v6227_v35 }
 0x2f8   :  { %3012 = vmatpush.msra.mxu1 %v6229_v15  ;;  %2951 = vmatpush.msra.mxu3 %v6227_v35 }
 0x2f9   :  { %2914 = vmatpush.msra.mxu2 %v6230_v16  ;;  %2975 = vmatpush.msra.mxu0 %v5473_v24 }
 0x2fa   :  { %3018 = vmatpush.msra.mxu1 %v6231_v49 }
 0x2fb   :  { %2918 = vmatpush.msra.mxu2 %v6232_v51  ;;  %2977 = vmatpush.msra.mxu0 %v5486_v33  ;;  %v6238_v51 = vld [vmem:[#allocation23_spill] sm:$0xff] }
 0x2fc   :  { %3024 = vmatpush.msra.mxu1 %v6233_v53 }
 0x2fd   :  { %2922 = vmatpush.msra.mxu2 %v6234_v25  ;;  %2979 = vmatpush.msra.mxu0 %v5500_v40  ;;  %v6236_v25 = vld [vmem:[#allocation19_spill] sm:$0xff] }
 0x2ff   :  { %2926 = vmatpush.msra.mxu2 %v6235_v3  ;;  %v5104_v3 = vld [vmem:[%s6160_s3] ss:$0 sm:$0xff] }
 0x348   :  { %v2273_v36 = vpop.f32.mrf.mxu1 }
 0x350   :  { %v2232_v62 = vpop.f32.mrf.mxu0  ;;  %v2303_v63 = vpop.f32.mrf.mxu2 }
 0x351   :  { %v2274_v8 = vadd.f32 %v2273_v36, %v2232_v62  ;;  %v2388_v2 = vpop.f32.mrf.mxu1  ;;  %v152_v62 = vadd.f32 %v5104_v3, %v6236_v25 }
 0x352   :  { %v2330_v6 = vpop.f32.mrf.mxu3 }
 0x353   :  { %v2304_v13 = vadd.f32 %v2303_v63, %v2274_v8 }
 0x355   :  { %v2331_v61 = vadd.f32 %v2330_v6, %v2304_v13  ;;  %v6237_v13 = vld [vmem:[#allocation22_spill] sm:$0xff] }
 0x356   :  { %v187_v6 = vadd.f32 %v6237_v13, %v152_v62  ;;  %v6241_v13 = vld [vmem:[#allocation30_spill] sm:$0xff] }
 0x358   :  { %v2363_v44 = vpop.f32.mrf.mxu0 }
 0x359   :  { %v2364_v27 = vadd.f32 %v2363_v44, %v2331_v61 }
 0x35b   :  { %v2389_v42 = vadd.f32 %v2388_v2, %v2364_v27 }
 0x35c   :  { %v2519_v53 = vpop.f32.mrf.mxu1 }
 0x35e   :  { %v2462_v57 = vpop.f32.mrf.mxu3 }
 0x360   :  { %v2492_v56 = vpop.f32.mrf.mxu0 }
 0x364   :  { %v2649_v27 = vpop.f32.mrf.mxu1 }
 0x366   :  { %v2421_v39 = vpop.f32.mrf.mxu2 }
 0x367   :  { %v2422_v9 = vadd.f32 %v2421_v39, %v2389_v42  ;;  %v2577_v63 = vpop.f32.mrf.mxu3  ;;  %v218_v42 = vadd.f32 %v6238_v51, %v187_v6 }
 0x368   :  { %v2608_v61 = vpop.f32.mrf.mxu0 }
 0x369   :  { %v2463_v49 = vadd.f32 %v2462_v57, %v2422_v9  ;;  %v2650_v39 = vadd.f32 %v2649_v27, %v2608_v61  ;;  %v249_v16 = vadd.f32 %v6239_v7, %v218_v42 }
 0x36b   :  { %v2493_v36 = vadd.f32 %v2492_v56, %v2463_v49 }
 0x36d   :  { %v2520_v8 = vadd.f32 %v2519_v53, %v2493_v36  ;;  %v6240_v53 = vld [vmem:[#allocation29_spill] sm:$0xff] }
 0x36e   :  { %v2552_v15 = vpop.f32.mrf.mxu2  ;;  %v280_v3 = vadd.f32 %v6240_v53, %v249_v16  ;;  %v6242_v53 = vld [vmem:[#allocation13_spill] sm:$0xff] }
 0x36f   :  { %v2553_v44 = vadd.f32 %v2552_v15, %v2520_v8  ;;  %v2706_v49 = vpop.f32.mrf.mxu3  ;;  %v2764_v8 = vpop.f32.mrf.mxu1 }
 0x370   :  { %v5875_v51 = vadd.f32 %v6241_v13, %v280_v3  ;;  %v6243_v3 = vld [vmem:[#allocation20_spill] sm:$0xff] }
 0x371   :  { %v2578_v2 = vadd.f32 %v2577_v63, %v2553_v44  ;;  %v2739_v36 = vpop.f32.mrf.mxu0 }
 0x373   :  { %v2580_v57 = vadd.f32 %v5634_v41, %v2578_v2 }
 0x375   :  { %5086 = vtanh.f32 %v2580_v57 }
 0x376   :  { %v2679_v9 = vpop.f32.mrf.mxu2 }
 0x377   :  { %v2680_v25 = vadd.f32 %v2679_v9, %v2650_v39 }
 0x379   :  { %v2707_v56 = vadd.f32 %v2706_v49, %v2680_v25 }
 0x37b   :  { %v5087_v62 = vpop.eup %5086  ;;  %v2740_v15 = vadd.f32 %v2739_v36, %v2707_v56  ;;  %v6244_v56 = vld [vmem:[#allocation14_spill] sm:$0xff]  ;;  %v6245_v36 = vld [vmem:[#allocation24_spill] sm:$0xff] }
 0x37c   :  { %v2770_v63 = vsel %vm309_vm1, %v5087_v62, 0  ;;  %v6246_v62 = vld [vmem:[#allocation16_spill] sm:$0xff] }
 0x37d   :  { %v2765_v41 = vadd.f32 %v2764_v8, %v2740_v15  ;;  %v2792_v6 = vand.u32 4294901760, %v2770_v63  ;;  %v6247_v15 = vld [vmem:[#allocation27_spill] sm:$0xff]  ;;  %v6248_v8 = vld [vmem:[#allocation17_spill] sm:$0xff] }
 0x37f   :  { %v2767_v44 = vadd.f32 %v2765_v41, %v5875_v51  ;;  %2838 = vmatmul.f32.vlgmr.msrb.gmra.mxu3 %v2792_v6  ;;  %v2793_v7 = vsub.f32 %v2770_v63, %v2792_v6  ;;  %v6249_v63 = vld [vmem:[#allocation28_spill] sm:$0xff] }
 0x380   :  { %3073 = vmatpush.msrb.mxu3 %v5459_v14 }
 0x381   :  { %5088 = vtanh.f32 %v2767_v44  ;;  %2868 = vmatmul.f32.vlgmr.msrb.gmra.mxu0 %v2793_v7  ;;  %v2794_v16 = vand.u32 4294901760, %v2793_v7 }
 0x382   :  { %3075 = vmatpush.msrb.mxu3 %v5473_v24  ;;  %3102 = vmatpush.msrb.mxu0 %v5481_v31 }
 0x383   :  { %2895 = vmatmul.f32.vlgmr.msrb.gmra.mxu1 %v2794_v16  ;;  %v2795_v61 = vsub.f32 %v2793_v7, %v2794_v16 }
 0x384   :  { %3077 = vmatpush.msrb.mxu3 %v5486_v33  ;;  %3133 = vmatpush.msrb.mxu1 %v5459_v14 }
 0x385   :  { %v2796_v2 = vand.u32 4294901760, %v2795_v61  ;;  %3106 = vmatpush.msrb.mxu0 %v5494_v37 }
 0x386   :  { %3079 = vmatpush.msrb.mxu3 %v5500_v40  ;;  %3135 = vmatpush.msrb.mxu1 %v5473_v24 }
 0x387   :  { %v5089_v27 = vpop.eup %5088  ;;  %2797 = vmatmul.f32.vlgmr.msrb.gmra.mxu2 %v2796_v2  ;;  %2953 = vmatmul.f32.vlgmr.msra.gmra.mxu3 %v2792_v6 }
 0x388   :  { %v2958_v42 = vsel %vm309_vm1, %v5089_v27, 0  ;;  %3044 = vmatpush.msrb.mxu2 %v5471_v23  ;;  %3137 = vmatpush.msrb.mxu1 %v5486_v33 }
 0x389   :  { %v5889_v57 = vand.u32 4294901760, %v2958_v42  ;;  %3193 = vmatpush.msra.mxu3 %v5347_v43  ;;  %3110 = vmatpush.msrb.mxu0 %v5511_v46 }
 0x38a   :  { %3047 = vmatpush.msrb.mxu2 %v5484_v32  ;;  %3139 = vmatpush.msrb.mxu1 %v5500_v40 }
 0x38b   :  { %v2981_v39 = vsub.f32 %v2958_v42, %v5889_v57  ;;  %3026 = vmatmul.f32.vlgmr.msra.gmra.mxu1 %v5889_v57  ;;  %3199 = vmatpush.msra.mxu3 %v6213_v50 }
 0x38c   :  { %3050 = vmatpush.msrb.mxu2 %v6215_v17  ;;  %3260 = vmatpush.msra.mxu1 %v5292_v10 }
 0x38d   :  { %v2982_v9 = vand.u32 4294901760, %v2981_v39  ;;  %3205 = vmatpush.msra.mxu3 %v5356_v47  ;;  %3114 = vmatpush.msrb.mxu0 %v6214_v60 }
 0x38e   :  { %3053 = vmatpush.msrb.mxu2 %v6216_v45  ;;  %3262 = vmatpush.msra.mxu1 %v5294_v11 }
 0x38f   :  { %2928 = vmatmul.f32.vlgmr.msra.gmra.mxu2 %v2792_v6  ;;  %3083 = vmatmul.f32.vlgmr.msrb.gmra.mxu3 %v2982_v9  ;;  %v2983_v25 = vsub.f32 %v2981_v39, %v2982_v9 }
 0x390   :  { %3211 = vmatpush.msra.mxu3 %v5362_v48  ;;  %3160 = vmatpush.msra.mxu2 %v5292_v10 }
 0x391   :  { %v2984_v49 = vand.u32 4294901760, %v2983_v25  ;;  %3264 = vmatpush.msra.mxu1 %v5308_v18 }
 0x392   :  { %3320 = vmatpush.msrb.mxu3 %v5292_v10  ;;  %3162 = vmatpush.msra.mxu2 %v5294_v11 }
 0x393   :  { %2985 = vmatmul.f32.vlgmr.msra.gmra.mxu0 %v2984_v49  ;;  %3141 = vmatmul.f32.vlgmr.msrb.gmra.mxu1 %v5889_v57 }
 0x394   :  { %3266 = vmatpush.msra.mxu1 %v5317_v22  ;;  %3322 = vmatpush.msrb.mxu3 %v5294_v11 }
 0x395   :  { %3164 = vmatpush.msra.mxu2 %v5308_v18  ;;  %3231 = vmatpush.msra.mxu0 %v5312_v20 }
 0x396   :  { %3324 = vmatpush.msrb.mxu3 %v5308_v18  ;;  %3386 = vmatpush.msrb.mxu1 %v5427_v1 }
 0x397   :  { %3056 = vmatmul.f32.vlgmr.msrb.gmra.mxu2 %v2981_v39  ;;  %3213 = vmatmul.f32.vlgmr.msra.gmra.mxu3 %v5889_v57 }
 0x398   :  { %3166 = vmatpush.msra.mxu2 %v5317_v22  ;;  %3234 = vmatpush.msra.mxu0 %v5315_v21 }
 0x399   :  { %3326 = vmatpush.msrb.mxu3 %v5317_v22  ;;  %3392 = vmatpush.msrb.mxu1 %v5442_v5 }
 0x39a   :  { %3289 = vmatpush.msrb.mxu2 %v5326_v28  ;;  %3237 = vmatpush.msra.mxu0 %v5322_v26 }
 0x39b   :  { %3116 = vmatmul.f32.vlgmr.msrb.gmra.mxu0 %v5889_v57  ;;  %3270 = vmatmul.f32.vlgmr.msra.gmra.mxu1 %v2982_v9 }
 0x39c   :  { %3293 = vmatpush.msrb.mxu2 %v5329_v29  ;;  %3240 = vmatpush.msra.mxu0 %v5332_v30 }
 0x39d   :  { %3398 = vmatpush.msrb.mxu1 %v5454_v12  ;;  %3453 = vmatpush.msra.mxu3 %v5394_v52 }
 0x39e   :  { %3297 = vmatpush.msrb.mxu2 %v5335_v34  ;;  %3353 = vmatpush.msrb.mxu0 %v5394_v52 }
 0x39f   :  { %3172 = vmatmul.f32.vlgmr.msra.gmra.mxu2 %v2984_v49  ;;  %3328 = vmatmul.f32.vlgmr.msrb.gmra.mxu3 %v5889_v57 }
 0x3a0   :  { %3301 = vmatpush.msrb.mxu2 %v5342_v38  ;;  %3404 = vmatpush.msrb.mxu1 %v5467_v19 }
 0x3a1   :  { %3455 = vmatpush.msra.mxu3 %v5397_v54  ;;  %3355 = vmatpush.msrb.mxu0 %v5397_v54 }
 0x3a2   :  { %3424 = vmatpush.msra.mxu2 %v5400_v55  ;;  %3513 = vmatpush.msra.mxu1 %v5394_v52 }
 0x3a3   :  { %3243 = vmatmul.f32.vlgmr.msra.gmra.mxu0 %v2981_v39  ;;  %3457 = vmatpush.msra.mxu3 %v5407_v58 }
 0x3a4   :  { %3427 = vmatpush.msra.mxu2 %v5410_v59  ;;  %3515 = vmatpush.msra.mxu1 %v5397_v54 }
 0x3a5   :  { %3357 = vmatpush.msrb.mxu0 %v5407_v58  ;;  %3459 = vmatpush.msra.mxu3 %v6227_v35 }
 0x3a6   :  { %3430 = vmatpush.msra.mxu2 %v5423_v0  ;;  %3517 = vmatpush.msra.mxu1 %v5407_v58 }
 0x3a7   :  { %3303 = vmatmul.f32.vlgmr.msrb.gmra.mxu2 %v5889_v57  ;;  %3359 = vmatpush.msrb.mxu0 %v6227_v35 }
 0x3a8   :  { %3433 = vmatpush.msra.mxu2 %v5436_v4  ;;  %3519 = vmatpush.msra.mxu1 %v6227_v35 }
 0x3a9   :  { %3482 = vmatpush.msra.mxu0 %v6242_v53  ;;  %3575 = vmatpush.msrb.mxu3 %v6243_v3 }
 0x3aa   :  { %3542 = vmatpush.msrb.mxu2 %v5459_v14 }
 0x3ab   :  { %3486 = vmatpush.msra.mxu0 %v6244_v56  ;;  %3581 = vmatpush.msrb.mxu3 %v6245_v36 }
 0x3ac   :  { %3544 = vmatpush.msrb.mxu2 %v5473_v24 }
 0x3ad   :  { %3490 = vmatpush.msra.mxu0 %v6246_v62  ;;  %3587 = vmatpush.msrb.mxu3 %v6247_v15 }
 0x3ae   :  { %3546 = vmatpush.msrb.mxu2 %v5486_v33 }
 0x3af   :  { %3494 = vmatpush.msra.mxu0 %v6248_v8  ;;  %3593 = vmatpush.msrb.mxu3 %v6249_v63 }
 0x3b0   :  { %3548 = vmatpush.msrb.mxu2 %v5500_v40 }
 0x3fe   :  { %v2869_v41 = vpop.f32.mrf.mxu0 }
 0x400   :  { %v2896_v6 = vpop.f32.mrf.mxu1 }
 0x402   :  { %v2839_v13 = vpop.f32.mrf.mxu3 }
 0x408   :  { %v3027_v39 = vpop.f32.mrf.mxu1 }
 0x40a   :  { %v2798_v44 = vpop.f32.mrf.mxu2  ;;  %v2954_v61 = vpop.f32.mrf.mxu3 }
 0x40b   :  { %v2840_v7 = vadd.f32 %v2839_v13, %v2798_v44 }
 0x40d   :  { %v2870_v16 = vadd.f32 %v2869_v41, %v2840_v7  ;;  %v5963_v41 = vld [vmem:[%s6163_s6] ss:$0 sm:$0xff] }
 0x40f   :  { %v2897_v27 = vadd.f32 %v2896_v6, %v2870_v16 }
 0x410   :  { %v2986_v2 = vpop.f32.mrf.mxu0  ;;  %v3142_v36 = vpop.f32.mrf.mxu1 }
 0x412   :  { %v2929_v42 = vpop.f32.mrf.mxu2  ;;  %v3084_v49 = vpop.f32.mrf.mxu3 }
 0x413   :  { %v2930_v57 = vadd.f32 %v2929_v42, %v2897_v27 }
 0x415   :  { %v2955_v9 = vadd.f32 %v2954_v61, %v2930_v57 }
 0x417   :  { %v2987_v25 = vadd.f32 %v2986_v2, %v2955_v9 }
 0x418   :  { %v3117_v62 = vpop.f32.mrf.mxu0  ;;  %v3271_v61 = vpop.f32.mrf.mxu1 }
 0x419   :  { %v3028_v8 = vadd.f32 %v3027_v39, %v2987_v25 }
 0x41a   :  { %v3057_v63 = vpop.f32.mrf.mxu2  ;;  %v3214_v35 = vpop.f32.mrf.mxu3 }
 0x41b   :  { %v3058_v15 = vadd.f32 %v3057_v63, %v3028_v8 }
 0x41d   :  { %v3085_v56 = vadd.f32 %v3084_v49, %v3058_v15 }
 0x41f   :  { %v3118_v53 = vadd.f32 %v3117_v62, %v3085_v56 }
 0x420   :  { %v3244_v7 = vpop.f32.mrf.mxu0 }
 0x421   :  { %v3143_v3 = vadd.f32 %v3142_v36, %v3118_v53 }
 0x422   :  { %v3173_v13 = vpop.f32.mrf.mxu2  ;;  %v3329_v56 = vpop.f32.mrf.mxu3 }
 0x423   :  { %v3145_v6 = vadd.f32 %v5963_v41, %v3143_v3  ;;  %v3215_v44 = vadd.f32 %v3214_v35, %v3173_v13 }
 0x425   :  { %5090 = vtanh.f32 %v3145_v6  ;;  %v3245_v16 = vadd.f32 %v3244_v7, %v3215_v44 }
 0x427   :  { %v3272_v2 = vadd.f32 %v3271_v61, %v3245_v16  ;;  %v6250_v61 = vld [vmem:[#allocation15_spill] sm:$0xff] }
 0x42a   :  { %v3304_v8 = vpop.f32.mrf.mxu2 }
 0x42b   :  { %v5091_v15 = vpop.eup %5090  ;;  %v3305_v63 = vadd.f32 %v3304_v8, %v3272_v2  ;;  %v6251_v2 = vld [vmem:[#allocation20_spill] sm:$0xff]  ;;  %v6252_v8 = vld [vmem:[#allocation13_spill] sm:$0xff] }
 0x42c   :  { %v3338_v53 = vsel %vm309_vm1, %v5091_v15, 0  ;;  %v6253_v15 = vld [vmem:[#allocation24_spill] sm:$0xff] }
 0x42d   :  { %v3330_v36 = vadd.f32 %v3329_v56, %v3305_v63  ;;  %v3360_v62 = vand.u32 4294901760, %v3338_v53  ;;  %v6254_v63 = vld [vmem:[#allocation14_spill] sm:$0xff]  ;;  %v6255_v56 = vld [vmem:[#allocation27_spill] sm:$0xff] }
 0x42f   :  { %v3333_v27 = vrot.slane %v3330_v36, 6  ;;  %3406 = vmatmul.f32.vlgmr.msrb.gmra.mxu1 %v3360_v62  ;;  %v3361_v42 = vsub.f32 %v3338_v53, %v3360_v62  ;;  %v6256_v53 = vld [vmem:[#allocation16_spill] sm:$0xff] }
 0x430   :  { %3642 = vmatpush.msrb.mxu1 %v5459_v14  ;;  %v6257_v36 = vld [vmem:[#allocation28_spill] sm:$0xff] }
 0x431   :  { %v3335_v35 = vadd.f32 %v3333_v27, %v5875_v51  ;;  %3436 = vmatmul.f32.vlgmr.msra.gmra.mxu2 %v3361_v42  ;;  %v3362_v3 = vand.u32 4294901760, %v3361_v42 }
 0x432   :  { %3644 = vmatpush.msrb.mxu1 %v5473_v24  ;;  %3671 = vmatpush.msra.mxu2 %v5481_v31 }
 0x433   :  { %5092 = vtanh.f32 %v3335_v35  ;;  %3463 = vmatmul.f32.vlgmr.msra.gmra.mxu3 %v3362_v3  ;;  %v3363_v57 = vsub.f32 %v3361_v42, %v3362_v3 }
 0x434   :  { %3646 = vmatpush.msrb.mxu1 %v5486_v33  ;;  %3702 = vmatpush.msra.mxu3 %v5459_v14 }
 0x435   :  { %v3364_v39 = vand.u32 4294901760, %v3363_v57  ;;  %3675 = vmatpush.msra.mxu2 %v5494_v37 }
 0x436   :  { %3648 = vmatpush.msrb.mxu1 %v5500_v40  ;;  %3704 = vmatpush.msra.mxu3 %v5473_v24 }
 0x437   :  { %3365 = vmatmul.f32.vlgmr.msrb.gmra.mxu0 %v3364_v39  ;;  %3521 = vmatmul.f32.vlgmr.msra.gmra.mxu1 %v3360_v62 }
 0x438   :  { %3613 = vmatpush.msrb.mxu0 %v5471_v23  ;;  %3706 = vmatpush.msra.mxu3 %v5486_v33 }
 0x439   :  { %v5093_v9 = vpop.eup %5092  ;;  %3762 = vmatpush.msra.mxu1 %v5347_v43  ;;  %3679 = vmatpush.msra.mxu2 %v5511_v46 }
 0x43a   :  { %v3526_v25 = vrot.slane %v5093_v9, 2  ;;  %3616 = vmatpush.msrb.mxu0 %v5484_v32  ;;  %3708 = vmatpush.msra.mxu3 %v5500_v40 }
 0x43b   :  { %3768 = vmatpush.msra.mxu1 %v6213_v50  ;;  %3683 = vmatpush.msra.mxu2 %v6214_v60 }
 0x43c   :  { %v3527_v49 = vsel %vm309_vm1, %v3526_v25, 0  ;;  %3619 = vmatpush.msrb.mxu0 %v6215_v17 }
 0x43d   :  { %v3549_v13 = vand.u32 4294901760, %v3527_v49  ;;  %3774 = vmatpush.msra.mxu1 %v5356_v47 }
 0x43e   :  { %3622 = vmatpush.msrb.mxu0 %v6216_v45 }
 0x43f   :  { %v3550_v6 = vsub.f32 %v3527_v49, %v3549_v13  ;;  %3496 = vmatmul.f32.vlgmr.msra.gmra.mxu0 %v3360_v62  ;;  %3595 = vmatmul.f32.vlgmr.msrb.gmra.mxu3 %v3549_v13  ;;  %v6258_v62 = vld [vmem:[#allocation17_spill] sm:$0xff] }
 0x440   :  { %3729 = vmatpush.msra.mxu0 %v5292_v10  ;;  %3829 = vmatpush.msrb.mxu3 %v5292_v10 }
 0x441   :  { %v3551_v44 = vand.u32 4294901760, %v3550_v6  ;;  %3780 = vmatpush.msra.mxu1 %v5362_v48 }
 0x442   :  { %3731 = vmatpush.msra.mxu0 %v5294_v11  ;;  %3831 = vmatpush.msrb.mxu3 %v5294_v11 }
 0x443   :  { %3652 = vmatmul.f32.vlgmr.msrb.gmra.mxu1 %v3551_v44  ;;  %v3552_v7 = vsub.f32 %v3550_v6, %v3551_v44 }
 0x444   :  { %3733 = vmatpush.msra.mxu0 %v5308_v18  ;;  %3833 = vmatpush.msrb.mxu3 %v5308_v18 }
 0x445   :  { %v3553_v16 = vand.u32 4294901760, %v3552_v7  ;;  %3889 = vmatpush.msrb.mxu1 %v5292_v10 }
 0x446   :  { %3735 = vmatpush.msra.mxu0 %v5317_v22  ;;  %3835 = vmatpush.msrb.mxu3 %v5317_v22 }
 0x447   :  { %3554 = vmatmul.f32.vlgmr.msrb.gmra.mxu2 %v3553_v16  ;;  %3625 = vmatmul.f32.vlgmr.msrb.gmra.mxu0 %v3550_v6 }
 0x448   :  { %3710 = vmatmul.f32.vlgmr.msra.gmra.mxu3 %v3549_v13  ;;  %3891 = vmatpush.msrb.mxu1 %v5294_v11 }
 0x449   :  { %3800 = vmatpush.msrb.mxu2 %v5312_v20  ;;  %3858 = vmatpush.msrb.mxu0 %v5326_v28 }
 0x44a   :  { %3893 = vmatpush.msrb.mxu1 %v5308_v18  ;;  %3955 = vmatpush.msra.mxu3 %v5427_v1 }
 0x44b   :  { %3782 = vmatmul.f32.vlgmr.msra.gmra.mxu1 %v3549_v13  ;;  %3803 = vmatpush.msrb.mxu2 %v5315_v21 }
 0x44c   :  { %3862 = vmatpush.msrb.mxu0 %v5329_v29  ;;  %3895 = vmatpush.msrb.mxu1 %v5317_v22 }
 0x44d   :  { %3806 = vmatpush.msrb.mxu2 %v5322_v26  ;;  %3961 = vmatpush.msra.mxu3 %v5442_v5 }
 0x44e   :  { %3866 = vmatpush.msrb.mxu0 %v5335_v34  ;;  %4022 = vmatpush.msra.mxu1 %v5394_v52 }
 0x44f   :  { %3685 = vmatmul.f32.vlgmr.msra.gmra.mxu2 %v3549_v13  ;;  %3741 = vmatmul.f32.vlgmr.msra.gmra.mxu0 %v3553_v16 }
 0x450   :  { %3839 = vmatmul.f32.vlgmr.msrb.gmra.mxu3 %v3551_v44  ;;  %3809 = vmatpush.msrb.mxu2 %v5332_v30 }
 0x451   :  { %3870 = vmatpush.msrb.mxu0 %v5342_v38  ;;  %3967 = vmatpush.msra.mxu3 %v5454_v12 }
 0x452   :  { %4024 = vmatpush.msra.mxu1 %v5397_v54  ;;  %3922 = vmatpush.msra.mxu2 %v5394_v52 }
 0x453   :  { %3993 = vmatpush.msra.mxu0 %v5400_v55  ;;  %3897 = vmatmul.f32.vlgmr.msrb.gmra.mxu1 %v3549_v13 }
 0x454   :  { %3973 = vmatpush.msra.mxu3 %v5467_v19  ;;  %4026 = vmatpush.msra.mxu1 %v5407_v58 }
 0x455   :  { %3996 = vmatpush.msra.mxu0 %v5410_v59  ;;  %3924 = vmatpush.msra.mxu2 %v5397_v54 }
 0x456   :  { %4082 = vmatpush.msrb.mxu3 %v5394_v52  ;;  %4028 = vmatpush.msra.mxu1 %v6250_v61 }
 0x457   :  { %3999 = vmatpush.msra.mxu0 %v5423_v0  ;;  %3812 = vmatmul.f32.vlgmr.msrb.gmra.mxu2 %v3550_v6 }
 0x458   :  { %3872 = vmatmul.f32.vlgmr.msrb.gmra.mxu0 %v3549_v13  ;;  %4084 = vmatpush.msrb.mxu3 %v5397_v54 }
 0x459   :  { %4002 = vmatpush.msra.mxu0 %v5436_v4  ;;  %3926 = vmatpush.msra.mxu2 %v5407_v58 }
 0x45a   :  { %4144 = vmatpush.msrb.mxu1 %v6251_v2  ;;  %4086 = vmatpush.msrb.mxu3 %v5407_v58 }
 0x45b   :  { %4111 = vmatpush.msrb.mxu0 %v5459_v14  ;;  %3928 = vmatpush.msra.mxu2 %v6250_v61 }
 0x45c   :  { %4150 = vmatpush.msrb.mxu1 %v6253_v15  ;;  %4088 = vmatpush.msrb.mxu3 %v6250_v61 }
 0x45d   :  { %4051 = vmatpush.msrb.mxu2 %v6252_v8  ;;  %4113 = vmatpush.msrb.mxu0 %v5473_v24 }
 0x45e   :  { %4156 = vmatpush.msrb.mxu1 %v6255_v56 }
 0x45f   :  { %4055 = vmatpush.msrb.mxu2 %v6254_v63  ;;  %4115 = vmatpush.msrb.mxu0 %v5486_v33 }
 0x460   :  { %4162 = vmatpush.msrb.mxu1 %v6257_v36 }
 0x461   :  { %4059 = vmatpush.msrb.mxu2 %v6256_v53  ;;  %4117 = vmatpush.msrb.mxu0 %v5500_v40 }
 0x463   :  { %4063 = vmatpush.msrb.mxu2 %v6258_v62 }
 0x4ac   :  { %v3407_v42 = vpop.f32.mrf.mxu1 }
 0x4b4   :  { %v3366_v27 = vpop.f32.mrf.mxu0  ;;  %v3437_v3 = vpop.f32.mrf.mxu2 }
 0x4b5   :  { %v3408_v35 = vadd.f32 %v3407_v42, %v3366_v27  ;;  %v3522_v49 = vpop.f32.mrf.mxu1 }
 0x4b6   :  { %v3464_v39 = vpop.f32.mrf.mxu3 }
 0x4b7   :  { %v3438_v57 = vadd.f32 %v3437_v3, %v3408_v35 }
 0x4b9   :  { %v3465_v25 = vadd.f32 %v3464_v39, %v3438_v57 }
 0x4bc   :  { %v3497_v9 = vpop.f32.mrf.mxu0 }
 0x4bd   :  { %v3498_v13 = vadd.f32 %v3497_v9, %v3465_v25 }
 0x4bf   :  { %v3523_v44 = vadd.f32 %v3522_v49, %v3498_v13 }
 0x4c0   :  { %v3653_v36 = vpop.f32.mrf.mxu1 }
 0x4c2   :  { %v3596_v6 = vpop.f32.mrf.mxu3 }
 0x4c4   :  { %v3626_v7 = vpop.f32.mrf.mxu0 }
 0x4c8   :  { %v3783_v35 = vpop.f32.mrf.mxu1 }
 0x4ca   :  { %v3555_v16 = vpop.f32.mrf.mxu2 }
 0x4cb   :  { %v3556_v53 = vadd.f32 %v3555_v16, %v3523_v44  ;;  %v3711_v62 = vpop.f32.mrf.mxu3 }
 0x4cc   :  { %v3742_v27 = vpop.f32.mrf.mxu0 }
 0x4cd   :  { %v3597_v56 = vadd.f32 %v3596_v6, %v3556_v53  ;;  %v3784_v57 = vadd.f32 %v3783_v35, %v3742_v27 }
 0x4cf   :  { %v3627_v63 = vadd.f32 %v3626_v7, %v3597_v56 }
 0x4d0   :  { %v3898_v53 = vpop.f32.mrf.mxu1 }
 0x4d1   :  { %v3654_v15 = vadd.f32 %v3653_v36, %v3627_v63 }
 0x4d2   :  { %v3686_v8 = vpop.f32.mrf.mxu2 }
 0x4d3   :  { %v3687_v2 = vadd.f32 %v3686_v8, %v3654_v15  ;;  %v3840_v25 = vpop.f32.mrf.mxu3 }
 0x4d5   :  { %v3712_v42 = vadd.f32 %v3711_v62, %v3687_v2  ;;  %v3873_v13 = vpop.f32.mrf.mxu0 }
 0x4d7   :  { %v3714_v3 = vadd.f32 %v5963_v41, %v3712_v42 }
 0x4d9   :  { %5094 = vtanh.f32 %v3714_v3 }
 0x4da   :  { %v3813_v39 = vpop.f32.mrf.mxu2 }
 0x4db   :  { %v3814_v9 = vadd.f32 %v3813_v39, %v3784_v57 }
 0x4dd   :  { %v3841_v49 = vadd.f32 %v3840_v25, %v3814_v9 }
 0x4df   :  { %v5095_v44 = vpop.eup %5094  ;;  %v3874_v16 = vadd.f32 %v3873_v13, %v3841_v49 }
 0x4e0   :  { %v3907_v63 = vsel %vm309_vm1, %v5095_v44, 0 }
 0x4e1   :  { %v3899_v56 = vadd.f32 %v3898_v53, %v3874_v16  ;;  %v3929_v36 = vand.u32 4294901760, %v3907_v63 }
 0x4e3   :  { %v3902_v8 = vrot.slane %v3899_v56, 4  ;;  %3975 = vmatmul.f32.vlgmr.msra.gmra.mxu3 %v3929_v36  ;;  %v3930_v2 = vsub.f32 %v3907_v63, %v3929_v36 }
 0x4e4   :  { %4211 = vmatpush.msra.mxu3 %v5459_v14 }
 0x4e5   :  { %v3904_v15 = vadd.f32 %v3902_v8, %v5875_v51  ;;  %4005 = vmatmul.f32.vlgmr.msra.gmra.mxu0 %v3930_v2  ;;  %v3931_v62 = vand.u32 4294901760, %v3930_v2 }
 0x4e6   :  { %4213 = vmatpush.msra.mxu3 %v5473_v24  ;;  %4240 = vmatpush.msra.mxu0 %v5481_v31 }
 0x4e7   :  { %5096 = vtanh.f32 %v3904_v15  ;;  %4032 = vmatmul.f32.vlgmr.msra.gmra.mxu1 %v3931_v62  ;;  %v3932_v6 = vsub.f32 %v3930_v2, %v3931_v62 }
 0x4e8   :  { %4215 = vmatpush.msra.mxu3 %v5486_v33  ;;  %4271 = vmatpush.msra.mxu1 %v5459_v14 }
 0x4e9   :  { %v3933_v7 = vand.u32 4294901760, %v3932_v6  ;;  %4244 = vmatpush.msra.mxu0 %v5494_v37 }
 0x4ea   :  { %4217 = vmatpush.msra.mxu3 %v5500_v40  ;;  %4273 = vmatpush.msra.mxu1 %v5473_v24 }
 0x4eb   :  { %3934 = vmatmul.f32.vlgmr.msra.gmra.mxu2 %v3933_v7  ;;  %4090 = vmatmul.f32.vlgmr.msrb.gmra.mxu3 %v3929_v36 }
 0x4ec   :  { %4182 = vmatpush.msra.mxu2 %v5471_v23  ;;  %4275 = vmatpush.msra.mxu1 %v5486_v33 }
 0x4ed   :  { %v5097_v27 = vpop.eup %5096  ;;  %4331 = vmatpush.msrb.mxu3 %v5347_v43  ;;  %4248 = vmatpush.msra.mxu0 %v5511_v46 }
 0x4ee   :  { %v4095_v42 = vrot.slane %v5097_v27, 4  ;;  %4185 = vmatpush.msra.mxu2 %v5484_v32  ;;  %4277 = vmatpush.msra.mxu1 %v5500_v40 }
 0x4ef   :  { %4337 = vmatpush.msrb.mxu3 %v6213_v50  ;;  %4252 = vmatpush.msra.mxu0 %v6214_v60 }
 0x4f0   :  { %v4096_v35 = vsel %vm309_vm1, %v4095_v42, 0  ;;  %4188 = vmatpush.msra.mxu2 %v6215_v17 }
 0x4f1   :  { %v4118_v3 = vand.u32 4294901760, %v4096_v35  ;;  %4343 = vmatpush.msrb.mxu3 %v5356_v47 }
 0x4f2   :  { %4191 = vmatpush.msra.mxu2 %v6216_v45 }
 0x4f3   :  { %v4119_v43 = vsub.f32 %v4096_v35, %v4118_v3  ;;  %4065 = vmatmul.f32.vlgmr.msrb.gmra.mxu2 %v3929_v36  ;;  %4164 = vmatmul.f32.vlgmr.msrb.gmra.mxu1 %v4118_v3 }
 0x4f4   :  { %4298 = vmatpush.msrb.mxu2 %v5292_v10  ;;  %4398 = vmatpush.msrb.mxu1 %v5292_v10 }
 0x4f5   :  { %v4120_v57 = vand.u32 4294901760, %v4119_v43  ;;  %4349 = vmatpush.msrb.mxu3 %v5362_v48 }
 0x4f6   :  { %4300 = vmatpush.msrb.mxu2 %v5294_v11  ;;  %4400 = vmatpush.msrb.mxu1 %v5294_v11 }
 0x4f7   :  { %4221 = vmatmul.f32.vlgmr.msra.gmra.mxu3 %v4120_v57  ;;  %v4121_v50 = vsub.f32 %v4119_v43, %v4120_v57 }
 0x4f8   :  { %4302 = vmatpush.msrb.mxu2 %v5308_v18  ;;  %4402 = vmatpush.msrb.mxu1 %v5308_v18 }
 0x4f9   :  { %v4122_v47 = vand.u32 4294901760, %v4121_v50  ;;  %4458 = vmatpush.msra.mxu3 %v5292_v10  ;;  %v6259_v10 = vld [vmem:[#allocation20_spill] sm:$0xff] }
 0x4fa   :  { %4304 = vmatpush.msrb.mxu2 %v5317_v22  ;;  %4404 = vmatpush.msrb.mxu1 %v5317_v22 }
 0x4fb   :  { %4123 = vmatmul.f32.vlgmr.msrb.gmra.mxu0 %v4122_v47  ;;  %4194 = vmatmul.f32.vlgmr.msra.gmra.mxu2 %v4119_v43 }
 0x4fc   :  { %4279 = vmatmul.f32.vlgmr.msra.gmra.mxu1 %v4118_v3  ;;  %4460 = vmatpush.msra.mxu3 %v5294_v11  ;;  %v6260_v11 = vld [vmem:[#allocation13_spill] sm:$0xff] }
 0x4fd   :  { %4427 = vmatpush.msra.mxu2 %v5326_v28  ;;  %4369 = vmatpush.msrb.mxu0 %v5312_v20  ;;  %v6262_v20 = vld [vmem:[#allocation14_spill] sm:$0xff]  ;;  %v6266_v28 = vld [vmem:[#allocation17_spill] sm:$0xff] }
 0x4fe   :  { %4462 = vmatpush.msra.mxu3 %v5308_v18  ;;  %4524 = vmatpush.msra.mxu1 %v5427_v1  ;;  %v6261_v18 = vld [vmem:[#allocation24_spill] sm:$0xff] }
 0x4ff   :  { %4351 = vmatmul.f32.vlgmr.msrb.gmra.mxu3 %v4118_v3  ;;  %4431 = vmatpush.msra.mxu2 %v5329_v29 }
 0x500   :  { %4372 = vmatpush.msrb.mxu0 %v5315_v21  ;;  %4464 = vmatpush.msra.mxu3 %v5317_v22  ;;  %v6263_v21 = vld [vmem:[#allocation27_spill] sm:$0xff]  ;;  %v6264_v22 = vld [vmem:[#allocation16_spill] sm:$0xff] }
 0x501   :  { %4435 = vmatpush.msra.mxu2 %v5335_v34  ;;  %4530 = vmatpush.msra.mxu1 %v5442_v5 }
 0x502   :  { %4375 = vmatpush.msrb.mxu0 %v5322_v26  ;;  %4591 = vmatpush.msrb.mxu3 %v5394_v52  ;;  %v6265_v26 = vld [vmem:[#allocation28_spill] sm:$0xff] }
 0x503   :  { %4254 = vmatmul.f32.vlgmr.msra.gmra.mxu0 %v4118_v3  ;;  %4310 = vmatmul.f32.vlgmr.msrb.gmra.mxu2 %v4122_v47 }
 0x504   :  { %4408 = vmatmul.f32.vlgmr.msrb.gmra.mxu1 %v4120_v57  ;;  %4439 = vmatpush.msra.mxu2 %v5342_v38 }
 0x505   :  { %4378 = vmatpush.msrb.mxu0 %v5332_v30  ;;  %4536 = vmatpush.msra.mxu1 %v5454_v12 }
 0x506   :  { %4562 = vmatpush.msrb.mxu2 %v5400_v55  ;;  %4593 = vmatpush.msrb.mxu3 %v5397_v54 }
 0x507   :  { %4466 = vmatmul.f32.vlgmr.msra.gmra.mxu3 %v4118_v3  ;;  %4542 = vmatpush.msra.mxu1 %v5467_v19 }
 0x508   :  { %4565 = vmatpush.msrb.mxu2 %v5410_v59  ;;  %4491 = vmatpush.msra.mxu0 %v5394_v52 }
 0x509   :  { %4595 = vmatpush.msrb.mxu3 %v5407_v58  ;;  %4651 = vmatpush.msrb.mxu1 %v5394_v52 }
 0x50a   :  { %4568 = vmatpush.msrb.mxu2 %v5423_v0  ;;  %4493 = vmatpush.msra.mxu0 %v5397_v54 }
 0x50b   :  { %4381 = vmatmul.f32.vlgmr.msrb.gmra.mxu0 %v4119_v43  ;;  %4441 = vmatmul.f32.vlgmr.msra.gmra.mxu2 %v4118_v3 }
 0x50c   :  { %4571 = vmatpush.msrb.mxu2 %v5436_v4  ;;  %4597 = vmatpush.msrb.mxu3 %v6250_v61 }
 0x50d   :  { %4653 = vmatpush.msrb.mxu1 %v5397_v54  ;;  %4495 = vmatpush.msra.mxu0 %v5407_v58 }
 0x50e   :  { %4713 = vmatpush.msra.mxu3 %v6259_v10  ;;  %4680 = vmatpush.msra.mxu2 %v5459_v14 }
 0x50f   :  { %4655 = vmatpush.msrb.mxu1 %v5407_v58  ;;  %4497 = vmatpush.msra.mxu0 %v6250_v61 }
 0x510   :  { %4719 = vmatpush.msra.mxu3 %v6261_v18  ;;  %4682 = vmatpush.msra.mxu2 %v5473_v24  ;;  %v99_v18 = vld [vmem:[%s6164_s7 + $0x8] sm:$0xff] }
 0x511   :  { %4620 = vmatpush.msrb.mxu0 %v6260_v11  ;;  %4657 = vmatpush.msrb.mxu1 %v6250_v61 }
 0x512   :  { %4725 = vmatpush.msra.mxu3 %v6263_v21  ;;  %4684 = vmatpush.msra.mxu2 %v5486_v33 }
 0x513   :  { %4624 = vmatpush.msrb.mxu0 %v6262_v20 }
 0x514   :  { %4731 = vmatpush.msra.mxu3 %v6265_v26  ;;  %4686 = vmatpush.msra.mxu2 %v5500_v40 }
 0x515   :  { %4628 = vmatpush.msrb.mxu0 %v6264_v22  ;;  %v4873_v22 = vand.u32 4294901760, %v99_v18 }
 0x517   :  { %4632 = vmatpush.msrb.mxu0 %v6266_v28  ;;  %v98_v28 = vld [vmem:[%s6164_s7] sm:$0xff] }
 0x562   :  { %v4006_v38 = vpop.f32.mrf.mxu0 }
 0x564   :  { %v4033_v48 = vpop.f32.mrf.mxu1 }
 0x566   :  { %v3976_v29 = vpop.f32.mrf.mxu3 }
 0x56e   :  { %v3935_v30 = vpop.f32.mrf.mxu2  ;;  %v4091_v54 = vpop.f32.mrf.mxu3 }
 0x56f   :  { %v3977_v34 = vadd.f32 %v3976_v29, %v3935_v30 }
 0x570   :  { %v4165_v0 = vpop.f32.mrf.mxu1 }
 0x571   :  { %v4007_v52 = vadd.f32 %v4006_v38, %v3977_v34  ;;  %v4911_v34 = vsub.f32 %v99_v18, %v4873_v22 }
 0x573   :  { %v4034_v55 = vadd.f32 %v4033_v48, %v4007_v52  ;;  %v4875_v48 = vand.u32 4294901760, %v98_v28 }
 0x576   :  { %v4066_v58 = vpop.f32.mrf.mxu2 }
 0x577   :  { %v4067_v59 = vadd.f32 %v4066_v58, %v4034_v55  ;;  %v4912_v58 = vand.u32 4294901760, %v4911_v34 }
 0x578   :  { %v4124_v1 = vpop.f32.mrf.mxu0 }
 0x579   :  { %v4092_v4 = vadd.f32 %v4091_v54, %v4067_v59  ;;  %v4280_v49 = vpop.f32.mrf.mxu1  ;;  %v4917_v59 = vsub.f32 %v98_v28, %v4875_v48 }
 0x57a   :  { %v4222_v12 = vpop.f32.mrf.mxu3 }
 0x57b   :  { %v4125_v5 = vadd.f32 %v4124_v1, %v4092_v4  ;;  %v4913_v1 = vsub.f32 %v4911_v34, %v4912_v58 }
 0x57d   :  { %v4166_v19 = vadd.f32 %v4165_v0, %v4125_v5  ;;  %v4918_v5 = vand.u32 4294901760, %v4917_v59 }
 0x57e   :  { %v4195_v61 = vpop.f32.mrf.mxu2 }
 0x57f   :  { %v4196_v39 = vadd.f32 %v4195_v61, %v4166_v19  ;;  %v4914_v19 = vand.u32 4294901760, %v4913_v1  ;;  %v4919_v61 = vsub.f32 %v4917_v59, %v4918_v5 }
 0x580   :  { %v4255_v9 = vpop.f32.mrf.mxu0 }
 0x581   :  { %v4223_v25 = vadd.f32 %v4222_v12, %v4196_v39  ;;  %v4409_v2 = vpop.f32.mrf.mxu1 }
 0x582   :  { %v4352_v16 = vpop.f32.mrf.mxu3 }
 0x583   :  { %v4256_v13 = vadd.f32 %v4255_v9, %v4223_v25  ;;  %v4920_v25 = vand.u32 4294901760, %v4919_v61 }
 0x585   :  { %v4281_v44 = vadd.f32 %v4280_v49, %v4256_v13 }
 0x586   :  { %v4311_v53 = vpop.f32.mrf.mxu2 }
 0x587   :  { %v4283_v63 = vadd.f32 %v5963_v41, %v4281_v44  ;;  %v4353_v56 = vadd.f32 %v4352_v16, %v4311_v53 }
 0x588   :  { %v4382_v36 = vpop.f32.mrf.mxu0 }
 0x589   :  { %5098 = vtanh.f32 %v4283_v63  ;;  %v4383_v8 = vadd.f32 %v4382_v36, %v4353_v56 }
 0x58a   :  { %v4467_v42 = vpop.f32.mrf.mxu3 }
 0x58b   :  { %v4410_v15 = vadd.f32 %v4409_v2, %v4383_v8 }
 0x58e   :  { %v4442_v62 = vpop.f32.mrf.mxu2 }
 0x58f   :  { %v5099_v6 = vpop.eup %5098  ;;  %v4443_v7 = vadd.f32 %v4442_v62, %v4410_v15 }
 0x590   :  { %v4476_v27 = vsel %vm309_vm1, %v5099_v6, 0 }
 0x591   :  { %v4468_v35 = vadd.f32 %v4467_v42, %v4443_v7  ;;  %v4498_v3 = vand.u32 4294901760, %v4476_v27 }
 0x593   :  { %v4471_v43 = vrot.slane %v4468_v35, 2  ;;  %4544 = vmatmul.f32.vlgmr.msra.gmra.mxu1 %v4498_v3  ;;  %v4499_v57 = vsub.f32 %v4476_v27, %v4498_v3 }
 0x594   :  { %4780 = vmatpush.msra.mxu1 %v5459_v14 }
 0x595   :  { %v4473_v50 = vadd.f32 %v4471_v43, %v5875_v51  ;;  %4574 = vmatmul.f32.vlgmr.msrb.gmra.mxu2 %v4499_v57  ;;  %v4500_v47 = vand.u32 4294901760, %v4499_v57 }
 0x596   :  { %4782 = vmatpush.msra.mxu1 %v5473_v24  ;;  %4809 = vmatpush.msrb.mxu2 %v5481_v31 }
 0x597   :  { %5100 = vtanh.f32 %v4473_v50  ;;  %4601 = vmatmul.f32.vlgmr.msrb.gmra.mxu3 %v4500_v47  ;;  %v4501_v10 = vsub.f32 %v4499_v57, %v4500_v47 }
 0x598   :  { %4784 = vmatpush.msra.mxu1 %v5486_v33  ;;  %4840 = vmatpush.msrb.mxu3 %v5459_v14 }
 0x599   :  { %v4502_v11 = vand.u32 4294901760, %v4501_v10  ;;  %4813 = vmatpush.msrb.mxu2 %v5494_v37 }
 0x59a   :  { %4786 = vmatpush.msra.mxu1 %v5500_v40  ;;  %4842 = vmatpush.msrb.mxu3 %v5473_v24 }
 0x59b   :  { %4503 = vmatmul.f32.vlgmr.msra.gmra.mxu0 %v4502_v11  ;;  %4659 = vmatmul.f32.vlgmr.msrb.gmra.mxu1 %v4498_v3 }
 0x59c   :  { %4751 = vmatpush.msra.mxu0 %v5471_v23  ;;  %4844 = vmatpush.msrb.mxu3 %v5486_v33 }
 0x59d   :  { %v5101_v31 = vpop.eup %5100  ;;  %4817 = vmatpush.msrb.mxu2 %v5511_v46 }
 0x59e   :  { %v4664_v51 = vrot.slane %v5101_v31, 6  ;;  %4754 = vmatpush.msra.mxu0 %v5484_v32  ;;  %4846 = vmatpush.msrb.mxu3 %v5500_v40  ;;  %v101_v32 = vld [vmem:[%s6164_s7 + $0x18] sm:$0xff]  ;;  %v5071_v31 = vld [vmem:[%s6165_s8] ss:$0 sm:$0xff] }
 0x59f   :  { %4821 = vmatpush.msrb.mxu2 %v6214_v60  ;;  %v4869_v40 = vand.u32 4294901760, %v101_v32  ;;  %v100_v60 = vld [vmem:[%s6164_s7 + $0x10] sm:$0xff] }
 0x5a0   :  { %v4665_v14 = vsel %vm309_vm1, %v4664_v51, 0  ;;  %4757 = vmatpush.msra.mxu0 %v6215_v17 }
 0x5a1   :  { %v4687_v24 = vand.u32 4294901760, %v4665_v14  ;;  %v4899_v17 = vsub.f32 %v101_v32, %v4869_v40 }
 0x5a2   :  { %4760 = vmatpush.msra.mxu0 %v6216_v45  ;;  %v4871_v45 = vand.u32 4294901760, %v100_v60 }
 0x5a3   :  { %v4688_v23 = vsub.f32 %v4665_v14, %v4687_v24  ;;  %4634 = vmatmul.f32.vlgmr.msrb.gmra.mxu0 %v4498_v3  ;;  %4733 = vmatmul.f32.vlgmr.msra.gmra.mxu3 %v4687_v24  ;;  %v4900_v20 = vand.u32 4294901760, %v4899_v17 }
 0x5a4   :  { %4970 = vmatpush.msra.mxu3 %v4869_v40  ;;  %4870 = vmatpush.msrb.mxu0 %v4869_v40  ;;  %v4905_v21 = vsub.f32 %v100_v60, %v4871_v45 }
 0x5a5   :  { %v4689_v33 = vand.u32 4294901760, %v4688_v23  ;;  %v4901_v29 = vsub.f32 %v4899_v17, %v4900_v20 }
 0x5a6   :  { %4972 = vmatpush.msra.mxu3 %v4871_v45  ;;  %4872 = vmatpush.msrb.mxu0 %v4871_v45  ;;  %v4906_v30 = vand.u32 4294901760, %v4905_v21 }
 0x5a7   :  { %4790 = vmatmul.f32.vlgmr.msra.gmra.mxu1 %v4689_v33  ;;  %v4690_v37 = vsub.f32 %v4688_v23, %v4689_v33  ;;  %v4902_v54 = vand.u32 4294901760, %v4901_v29 }
 0x5a8   :  { %4974 = vmatpush.msra.mxu3 %v4873_v22  ;;  %4874 = vmatpush.msrb.mxu0 %v4873_v22  ;;  %v4907_v55 = vsub.f32 %v4905_v21, %v4906_v30 }
 0x5a9   :  { %v4691_v46 = vand.u32 4294901760, %v4690_v37  ;;  %4903 = vmatpush.msrb.mxu1 %v4902_v54 }
 0x5aa   :  { %4976 = vmatpush.msra.mxu3 %v4875_v48  ;;  %4876 = vmatpush.msrb.mxu0 %v4875_v48  ;;  %v4908_v0 = vand.u32 4294901760, %v4907_v55 }
 0x5ab   :  { %4692 = vmatmul.f32.vlgmr.msra.gmra.mxu2 %v4691_v46  ;;  %4763 = vmatmul.f32.vlgmr.msra.gmra.mxu0 %v4688_v23 }
 0x5ac   :  { %4848 = vmatmul.f32.vlgmr.msrb.gmra.mxu3 %v4687_v24  ;;  %4941 = vmatpush.msra.mxu2 %v4899_v17 }
 0x5ad   :  { %4999 = vmatpush.msra.mxu0 %v4900_v20  ;;  %4909 = vmatpush.msrb.mxu1 %v4908_v0 }
 0x5ae   :  { %4944 = vmatpush.msra.mxu2 %v4905_v21 }
 0x5af   :  { %5003 = vmatpush.msra.mxu0 %v4906_v30  ;;  %4915 = vmatpush.msrb.mxu1 %v4914_v19 }
 0x5b0   :  { %4947 = vmatpush.msra.mxu2 %v4911_v34 }
 0x5b1   :  { %5007 = vmatpush.msra.mxu0 %v4912_v58  ;;  %4921 = vmatpush.msrb.mxu1 %v4920_v25 }
 0x5b2   :  { %4950 = vmatpush.msra.mxu2 %v4917_v59 }
 0x5b3   :  { %4823 = vmatmul.f32.vlgmr.msrb.gmra.mxu2 %v4687_v24  ;;  %5011 = vmatpush.msra.mxu0 %v4918_v5 }
 0x5b4   :  { %5030 = vmatpush.msra.mxu1 %v4869_v40 }
 0x5b6   :  { %5032 = vmatpush.msra.mxu1 %v4871_v45 }
 0x5b8   :  { %5034 = vmatpush.msra.mxu1 %v4873_v22 }
 0x5ba   :  { %5036 = vmatpush.msra.mxu1 %v4875_v48 }
 0x610   :  { %v4545_v38 = vpop.f32.mrf.mxu1 }
 0x618   :  { %v4504_v26 = vpop.f32.mrf.mxu0  ;;  %v4575_v4 = vpop.f32.mrf.mxu2 }
 0x619   :  { %v4546_v52 = vadd.f32 %v4545_v38, %v4504_v26  ;;  %v4660_v44 = vpop.f32.mrf.mxu1 }
 0x61a   :  { %v4602_v39 = vpop.f32.mrf.mxu3 }
 0x61b   :  { %v4576_v12 = vadd.f32 %v4575_v4, %v4546_v52 }
 0x61d   :  { %v4603_v49 = vadd.f32 %v4602_v39, %v4576_v12 }
 0x620   :  { %v4635_v9 = vpop.f32.mrf.mxu0 }
 0x621   :  { %v4636_v13 = vadd.f32 %v4635_v9, %v4603_v49 }
 0x623   :  { %v4661_v16 = vadd.f32 %v4660_v44, %v4636_v13 }
 0x624   :  { %v4791_v15 = vpop.f32.mrf.mxu1 }
 0x626   :  { %v4734_v53 = vpop.f32.mrf.mxu3 }
 0x628   :  { %v4764_v8 = vpop.f32.mrf.mxu0 }
 0x62e   :  { %v4693_v63 = vpop.f32.mrf.mxu2 }
 0x62f   :  { %v4694_v56 = vadd.f32 %v4693_v63, %v4661_v16  ;;  %v4849_v27 = vpop.f32.mrf.mxu3 }
 0x631   :  { %v4735_v36 = vadd.f32 %v4734_v53, %v4694_v56 }
 0x633   :  { %v4765_v2 = vadd.f32 %v4764_v8, %v4735_v36 }
 0x635   :  { %v4792_v62 = vadd.f32 %v4791_v15, %v4765_v2 }
 0x636   :  { %v4824_v6 = vpop.f32.mrf.mxu2 }
 0x637   :  { %v4825_v7 = vadd.f32 %v4824_v6, %v4792_v62 }
 0x639   :  { %v4850_v42 = vadd.f32 %v4849_v27, %v4825_v7 }
 0x63b   :  { %v4852_v35 = vadd.f32 %v5963_v41, %v4850_v42 }
 0x63d   :  { %5102 = vtanh.f32 %v4852_v35 }
 0x643   :  { %v5103_v3 = vpop.eup %5102 }
 0x644   :  { %v4855_v43 = vsel %vm309_vm1, %v5103_v3, 0 }
 0x645   :  { %v4877_v57 = vand.u32 4294901760, %v4855_v43 }
 0x647   :  { %4923 = vmatmul.f32.vlgmr.msrb.gmra.mxu1 %v4877_v57  ;;  %v4878_v50 = vsub.f32 %v4855_v43, %v4877_v57 }
 0x649   :  { %4953 = vmatmul.f32.vlgmr.msra.gmra.mxu2 %v4878_v50  ;;  %v4879_v47 = vand.u32 4294901760, %v4878_v50 }
 0x64b   :  { %4980 = vmatmul.f32.vlgmr.msra.gmra.mxu3 %v4879_v47  ;;  %v4880_v10 = vsub.f32 %v4878_v50, %v4879_v47 }
 0x64d   :  { %v4881_v11 = vand.u32 4294901760, %v4880_v10 }
 0x64f   :  { %4882 = vmatmul.f32.vlgmr.msrb.gmra.mxu0 %v4881_v11  ;;  %5038 = vmatmul.f32.vlgmr.msra.gmra.mxu1 %v4877_v57 }
 0x657   :  { %5013 = vmatmul.f32.vlgmr.msra.gmra.mxu0 %v4877_v57 }
 0x6c4   :  { %v4924_v41 = vpop.f32.mrf.mxu1 }
 0x6cc   :  { %v4883_v51 = vpop.f32.mrf.mxu0  ;;  %v4954_v23 = vpop.f32.mrf.mxu2 }
 0x6cd   :  { %v4884_v14 = vadd.f32 %v5071_v31, %v4883_v51  ;;  %v5039_v60 = vpop.f32.mrf.mxu1 }
 0x6ce   :  { %v4981_v37 = vpop.f32.mrf.mxu3 }
 0x6cf   :  { %v4925_v24 = vadd.f32 %v4924_v41, %v4884_v14 }
 0x6d1   :  { %v4955_v33 = vadd.f32 %v4954_v23, %v4925_v24 }
 0x6d3   :  { %v4982_v46 = vadd.f32 %v4981_v37, %v4955_v33 }
 0x6d4   :  { %v5014_v32 = vpop.f32.mrf.mxu0 }
 0x6d5   :  { %v5015_v40 = vadd.f32 %v5014_v32, %v4982_v46 }
 0x6d7   :  { %v5040_v17 = vadd.f32 %v5039_v60, %v5015_v40 }
 0x6d9   :  { %5043 = vst.msk [vmem:[#allocation8] sm:$0x3] %vm5042_vm2, %v5040_v17 }
 0x6da   :  { %5054 = dma.vmem_to_hbm [thread:$0]  %s5050_s5, 32, %s5052_s28, [#allocation4]  }
 0x6db   :  { %5206 = dma.done.wait [#allocation4], 32  }
 0x6dc   :  { %5207 = vsyncadd [#allocation4], 4294967264 }
 0x6dd   :  { %5059 = vsyncpa [#allocation3], 1 }
 0x6de   :  { %5060 = vsyncpa [#allocation6], 1 }
 0x6df   :  { %5061 = vsyncpa [#allocation4], 1 }

</bundles_post_ra>
